<compile_context>
chip_gen: v5e
topology: v5e:2x2
jax: 0.10.0
libtpu: 0.0.40
codegen_flags: <defaults>
</compile_context>

<pallas_src>
import functools

import jax
import jax.numpy as jnp
from jax.experimental import pallas as pl
from jax.experimental.pallas import tpu as pltpu


# --------------- fused attention (query-tiled) + BatchNorm + LeakyReLU ---------------
def _attn_bn_kernel(x_full_ref, x_qt_ref, wqk_ref, wout_ref, bout_ref,
                    gamma_ref, beta_ref, o_ref, attn_ref,
                    *, inner, eps, neg_slope):
    B, Cout, N = o_ref.shape
    TQ = x_qt_ref.shape[-1]
    b = pl.program_id(0)
    t = pl.program_id(1)
    scale = inner ** -0.5

    x_b = x_full_ref[0]            # (C, N)  keys/values for this batch (lane-dense)
    x_q = x_qt_ref[0]              # (C, TQ) query columns of this tile
    wqk = wqk_ref[...]             # (2*inner, C) fused projection weight

    # Projections.  wq / wk are free sublane slices (row offset 32) of wqk.
    # kT is recomputed per query tile; at K=4 this matmul is negligible.
    kT = jnp.dot(wqk[inner:], x_b, preferred_element_type=jnp.float32)     # (inner, N)
    qT = jnp.dot(wqk[:inner], x_q, preferred_element_type=jnp.float32)     # (inner, TQ)

    # dots[i, j] = sum_d q[i, d] * k[j, d]  -> contract leading dims, no big transpose.
    dots = jax.lax.dot_general(qT, kT, (((0,), (0,)), ((), ())),
                               preferred_element_type=jnp.float32) * scale  # (TQ, N)

    # Row softmax over the key axis.
    m = jnp.max(dots, axis=-1, keepdims=True)
    e = jnp.exp(dots - m)
    denom = jnp.sum(e, axis=-1, keepdims=True)
    r = pl.reciprocal(denom, approx=True)          # EUP vrcp (free slot)
    r = r * (2.0 - denom * r)                      # one Newton step -> f32-exact
    attn = e * r                                   # (TQ, N)
    attn_ref[0] = attn                             # pipelined per-tile writeback

    # out^T[c, i] = sum_j attn[i, j] * x_b[c, j]  (trailing-dim contraction; keeps
    # the channel-major layout, never materializes nf = x^T).
    outT = jax.lax.dot_general(x_b, attn, (((1,), (1,)), ((), ())),
                               preferred_element_type=jnp.float32)          # (C, TQ)
    y = jnp.dot(wout_ref[...], outT,
                preferred_element_type=jnp.float32) + bout_ref[...]         # (Cout, TQ)

    # Stash the pre-BN tile into the VMEM-resident output block (accumulator
    # pattern: o's block index is constant across the grid).  Static batch
    # index via pl.when keeps all sublane offsets static.
    col = pl.multiple_of(t * TQ, TQ)
    for b_idx in range(B):
        @pl.when(b == b_idx)
        def _store(b_idx=b_idx):
            o_ref[b_idx, :, pl.ds(col, TQ)] = y

    # Training-mode BatchNorm2d (biased batch stats over batch & spatial) +
    # LeakyReLU epilogue on the resident block at the last grid step.
    # TODO(synk): on v7x, split the grid across both TensorCores and do this
    # reduction cross-core (CMEM/VMEM_SHARED + core_barrier).
    @pl.when(jnp.logical_and(b == B - 1, t == pl.num_programs(1) - 1))
    def _bn_lrelu():
        inv = 1.0 / (B * N)
        s = None
        for bi in range(B):
            rs = jnp.sum(o_ref[bi], axis=-1, keepdims=True)                 # (Cout, 1)
            s = rs if s is None else s + rs
        mean = s * inv
        s2 = None
        for bi in range(B):
            d = o_ref[bi] - mean
            rs = jnp.sum(d * d, axis=-1, keepdims=True)
            s2 = rs if s2 is None else s2 + rs
        var = s2 * inv
        gscale = gamma_ref[...] * jax.lax.rsqrt(var + eps)                  # (Cout, 1)
        beta = beta_ref[...]
        for bi in range(B):
            z = (o_ref[bi] - mean) * gscale + beta                          # (Cout, N)
            o_ref[bi] = jnp.where(z >= 0, z, z * neg_slope)                 # LeakyReLU


def fused_attention_bn_pallas(x_cn, wqk, wout, bout, gamma, beta, *,
                              inner_dim, tq=128, eps=1e-5, neg_slope=0.01):
    """x_cn: (B, C, N) f32 channel-major; wqk: (2*inner, C); wout: (Cout, C);
    bout/gamma/beta: (Cout, 1).  Returns ((B, Cout, N) activations, (B, N, N) attn)."""
    B, C, N = x_cn.shape
    Cout = wout.shape[0]
    assert N % tq == 0 and tq % 128 == 0, "query tile must be a 128-multiple dividing N"
    nt = N // tq

    kernel = functools.partial(_attn_bn_kernel, inner=inner_dim, eps=eps,
                               neg_slope=neg_slope)
    grid_spec = pltpu.PrefetchScalarGridSpec(
        num_scalar_prefetch=0,
        grid=(B, nt),
        in_specs=[
            pl.BlockSpec((1, C, N), lambda b, t: (b, 0, 0)),        # full keys/values
            pl.BlockSpec((1, C, tq), lambda b, t: (b, 0, t)),       # query tile
            pl.BlockSpec((2 * inner_dim, C), lambda b, t: (0, 0)),  # fused wqk
            pl.BlockSpec((Cout, C), lambda b, t: (0, 0)),           # wout
            pl.BlockSpec((Cout, 1), lambda b, t: (0, 0)),           # bout
            pl.BlockSpec((Cout, 1), lambda b, t: (0, 0)),           # gamma
            pl.BlockSpec((Cout, 1), lambda b, t: (0, 0)),           # beta
        ],
        out_specs=[
            pl.BlockSpec((B, Cout, N), lambda b, t: (0, 0, 0)),     # resident accumulator
            pl.BlockSpec((1, tq, N), lambda b, t: (b, t, 0)),       # pipelined attn tiles
        ],
    )
    o, attn = pl.pallas_call(
        kernel,
        grid_spec=grid_spec,
        out_shape=[jax.ShapeDtypeStruct((B, Cout, N), jnp.float32),
                   jax.ShapeDtypeStruct((B, N, N), jnp.float32)],
        compiler_params=pltpu.CompilerParams(
            dimension_semantics=("arbitrary", "arbitrary")),
    )(x_cn, x_cn, wqk, wout, bout, gamma, beta)
    return o, attn


# --------------------------------- Module wrapper ---------------------------------
def attention_module_forward(x, params, inner_dim):
    """x: (B, C, H, W) f32 NCHW. Returns (activations (B,C,H,W), attn (B,N,N))."""
    B, C, H, W = x.shape
    N = H * W

    # channel-major (B, C, N): free contiguous reshape, lane-dense N axis.
    x_cn = x.reshape(B, C, N)

    wqk = params["wqk"]                        # (2*inner, C) -- kept fused
    wout = params["wout"]                      # (Cout, C)
    Cout = wout.shape[0]
    bout = params["bout"].reshape(Cout, 1)
    gamma = params["gamma"].reshape(Cout, 1)
    beta = params["beta"].reshape(Cout, 1)

    y, attn = fused_attention_bn_pallas(x_cn, wqk, wout, bout, gamma, beta,
                                        inner_dim=inner_dim)

    # y is already channel-major (B, Cout, N) -> NCHW is a free reshape.
    out = y.reshape(B, Cout, H, W)
    return out, attn


# ----------------------------------- Reference ------------------------------------
def reference_forward(x, params, inner_dim, eps=1e-5, neg_slope=0.01):
    hp = jax.lax.Precision.HIGHEST
    B, C, H, W = x.shape
    nf = jnp.transpose(x.reshape(B, C, H * W), (0, 2, 1))
    qk = jnp.einsum("bnc,dc->bnd", nf, params["wqk"], precision=hp)
    q, k = qk[..., :inner_dim], qk[..., inner_dim:]
    dots = jnp.einsum("bid,bjd->bij", q, k, precision=hp) * (inner_dim ** -0.5)
    attn = jax.nn.softmax(dots, axis=-1)
    out = jnp.einsum("bij,bjd->bid", attn, nf, precision=hp)
    out = jnp.einsum("bno,co->bnc", out, params["wout"], precision=hp) + params["bout"]
    out = jnp.transpose(out, (0, 2, 1)).reshape(B, C, H, W)
    mean = out.mean(axis=(0, 2, 3), keepdims=True)
    var = ((out - mean) ** 2).mean(axis=(0, 2, 3), keepdims=True)
    xhat = (out - mean) / jnp.sqrt(var + eps)
    z = xhat * params["gamma"].reshape(1, -1, 1, 1) + params["beta"].reshape(1, -1, 1, 1)
    return jnp.where(z >= 0, z, neg_slope * z), attn


# ------------------------------------- Main ----------------------------------------
if __name__ == "__main__":
    B, C, H, W = 2, 4, 16, 16
    dim = C
    inner_dim = 32
    output_size = C            # required by `.view(B, C, H, W)` in the reference

    key = jax.random.PRNGKey(0)
    kx, kqk, kwo, kbo = jax.random.split(key, 4)

    x = jax.random.normal(kx, (B, C, H, W), dtype=jnp.float32)

    bound_qk = 1.0 / (dim ** 0.5)
    params = {
        "wqk": jax.random.uniform(kqk, (2 * inner_dim, dim), jnp.float32,
                                  -bound_qk, bound_qk),
        "wout": jax.random.uniform(kwo, (output_size, dim), jnp.float32,
                                   -bound_qk, bound_qk),
        "bout": jax.random.uniform(kbo, (output_size,), jnp.float32,
                                   -bound_qk, bound_qk),
        "gamma": jnp.ones((output_size,), jnp.float32),
        "beta": jnp.zeros((output_size,), jnp.float32),
    }

    forward = jax.jit(functools.partial(attention_module_forward, inner_dim=inner_dim))
    out, attn = forward(x, params)
    out = jax.block_until_ready(out)
    attn = jax.block_until_ready(attn)

    ref_out, ref_attn = reference_forward(x, params, inner_dim)
    assert out.shape == (B, C, H, W) and attn.shape == (B, H * W, H * W)
    assert jnp.allclose(attn, ref_attn, atol=1e-4, rtol=1e-4)
    assert jnp.allclose(out, ref_out, atol=1e-3, rtol=1e-3)

    print("KERNEL_OK")
</pallas_src>

<mosaic_0001>
module attributes {stable_mosaic.version = 11 : i64} {
  func.func @_attn_bn_kernel(%arg0: i32, %arg1: i32, %arg2: memref<1x4x256xf32, #tpu.memory_space<vmem>>, %arg3: memref<1x4x128xf32, #tpu.memory_space<vmem>>, %arg4: memref<64x4xf32, #tpu.memory_space<vmem>>, %arg5: memref<4x4xf32, #tpu.memory_space<vmem>>, %arg6: memref<4x1xf32, #tpu.memory_space<vmem>>, %arg7: memref<4x1xf32, #tpu.memory_space<vmem>>, %arg8: memref<4x1xf32, #tpu.memory_space<vmem>>, %arg9: memref<2x4x256xf32, #tpu.memory_space<vmem>>, %arg10: memref<1x128x256xf32, #tpu.memory_space<vmem>>) attributes {dimension_semantics = [#tpu.dimension_semantics<arbitrary>, #tpu.dimension_semantics<arbitrary>], iteration_bounds = array<i64: 2, 2>, scalar_prefetch = 0 : i64, scratch_operands = 0 : i64, tpu.core_type = #tpu.core_type<tc>, window_params = [{transform_indices = @transform_0, window_bounds = array<i64: 1, 4, 256>}, {transform_indices = @transform_1, window_bounds = array<i64: 1, 4, 128>}, {pipeline_mode = #tpu.pipeline_mode<synchronous>, transform_indices = @transform_2, window_bounds = array<i64: 64, 4>}, {pipeline_mode = #tpu.pipeline_mode<synchronous>, transform_indices = @transform_3, window_bounds = array<i64: 4, 4>}, {pipeline_mode = #tpu.pipeline_mode<synchronous>, transform_indices = @transform_4, window_bounds = array<i64: 4, 1>}, {pipeline_mode = #tpu.pipeline_mode<synchronous>, transform_indices = @transform_5, window_bounds = array<i64: 4, 1>}, {pipeline_mode = #tpu.pipeline_mode<synchronous>, transform_indices = @transform_6, window_bounds = array<i64: 4, 1>}, {pipeline_mode = #tpu.pipeline_mode<synchronous>, transform_indices = @transform_7, window_bounds = array<i64: 2, 4, 256>}, {transform_indices = @transform_8, window_bounds = array<i64: 1, 128, 256>}]} {
    %c0 = arith.constant 0 : index
    %c0_0 = arith.constant 0 : index
    %c0_1 = arith.constant 0 : index
    %0 = vector.load %arg2[%c0, %c0_0, %c0_1] : memref<1x4x256xf32, #tpu.memory_space<vmem>>, vector<1x4x256xf32>
    %1 = vector.shape_cast %0 : vector<1x4x256xf32> to vector<4x256xf32>
    %c0_2 = arith.constant 0 : index
    %c0_3 = arith.constant 0 : index
    %c0_4 = arith.constant 0 : index
    %2 = vector.load %arg3[%c0_2, %c0_3, %c0_4] : memref<1x4x128xf32, #tpu.memory_space<vmem>>, vector<1x4x128xf32>
    %3 = vector.shape_cast %2 : vector<1x4x128xf32> to vector<4x128xf32>
    %c0_5 = arith.constant 0 : index
    %c0_6 = arith.constant 0 : index
    %4 = vector.load %arg4[%c0_5, %c0_6] : memref<64x4xf32, #tpu.memory_space<vmem>>, vector<64x4xf32>
    %5 = vector.extract_strided_slice %4 {offsets = [32, 0], sizes = [32, 4], strides = [1, 1]} : vector<64x4xf32> to vector<32x4xf32>
    %cst = arith.constant dense<0.000000e+00> : vector<32x256xf32>
    %6 = tpu.matmul %5, %1, %cst {dimension_numbers = #tpu.dot_dimension_numbers<[1], [0], [0], [1], [0, 0, 1, 1], [], []>} : vector<32x4xf32>, vector<4x256xf32>, vector<32x256xf32> -> vector<32x256xf32>
    %7 = vector.extract_strided_slice %4 {offsets = [0, 0], sizes = [32, 4], strides = [1, 1]} : vector<64x4xf32> to vector<32x4xf32>
    %cst_7 = arith.constant dense<0.000000e+00> : vector<32x128xf32>
    %8 = tpu.matmul %7, %3, %cst_7 {dimension_numbers = #tpu.dot_dimension_numbers<[1], [0], [0], [1], [0, 0, 1, 1], [], []>} : vector<32x4xf32>, vector<4x128xf32>, vector<32x128xf32> -> vector<32x128xf32>
    %cst_8 = arith.constant dense<0.000000e+00> : vector<128x256xf32>
    %9 = tpu.matmul %8, %6, %cst_8 {dimension_numbers = #tpu.dot_dimension_numbers<[0], [0], [1], [1], [0, 1, 1, 1], [], []>} : vector<32x128xf32>, vector<32x256xf32>, vector<128x256xf32> -> vector<128x256xf32>
    %cst_9 = arith.constant 0.176776692 : f32
    %10 = vector.broadcast %cst_9 : f32 to vector<128x256xf32>
    %11 = arith.mulf %9, %10 : vector<128x256xf32>
    %cst_10 = arith.constant dense<0xFF800000> : vector<128xf32>
    %12 = vector.multi_reduction <maximumf>, %11, %cst_10 [1] : vector<128x256xf32> to vector<128xf32>
    %13 = vector.shape_cast %12 : vector<128xf32> to vector<128x1xf32>
    %14 = vector.broadcast %13 : vector<128x1xf32> to vector<128x256xf32>
    %15 = arith.subf %11, %14 : vector<128x256xf32>
    %16 = math.exp %15 : vector<128x256xf32>
    %cst_11 = arith.constant dense<0.000000e+00> : vector<128xf32>
    %17 = vector.multi_reduction <add>, %16, %cst_11 [1] : vector<128x256xf32> to vector<128xf32>
    %18 = vector.shape_cast %17 : vector<128xf32> to vector<128x1xf32>
    %19 = tpu.reciprocal %18 {approx = true} : vector<128x1xf32> -> vector<128x1xf32>
    %20 = arith.mulf %18, %19 : vector<128x1xf32>
    %cst_12 = arith.constant 2.000000e+00 : f32
    %21 = vector.broadcast %cst_12 : f32 to vector<128x1xf32>
    %22 = arith.subf %21, %20 : vector<128x1xf32>
    %23 = arith.mulf %19, %22 : vector<128x1xf32>
    %24 = vector.broadcast %23 : vector<128x1xf32> to vector<128x256xf32>
    %25 = arith.mulf %16, %24 : vector<128x256xf32>
    %c0_13 = arith.constant 0 : index
    %c0_14 = arith.constant 0 : index
    %c0_15 = arith.constant 0 : index
    %26 = vector.load %arg10[%c0_13, %c0_14, %c0_15] : memref<1x128x256xf32, #tpu.memory_space<vmem>>, vector<1x128x256xf32>
    %27 = vector.shape_cast %26 : vector<1x128x256xf32> to vector<128x256xf32>
    %28 = vector.shape_cast %25 : vector<128x256xf32> to vector<1x128x256xf32>
    tpu.vector_store %arg10[%c0_13, %c0_14, %c0_15], %28 {strides = array<i32>} : memref<1x128x256xf32, #tpu.memory_space<vmem>>, vector<1x128x256xf32>,
    %cst_16 = arith.constant dense<0.000000e+00> : vector<4x128xf32>
    %29 = tpu.matmul %1, %25, %cst_16 {dimension_numbers = #tpu.dot_dimension_numbers<[1], [1], [0], [0], [0, 0, 1, 0], [], []>} : vector<4x256xf32>, vector<128x256xf32>, vector<4x128xf32> -> vector<4x128xf32>
    %c0_17 = arith.constant 0 : index
    %c0_18 = arith.constant 0 : index
    %30 = vector.load %arg5[%c0_17, %c0_18] : memref<4x4xf32, #tpu.memory_space<vmem>>, vector<4x4xf32>
    %cst_19 = arith.constant dense<0.000000e+00> : vector<4x128xf32>
    %31 = tpu.matmul %30, %29, %cst_19 {dimension_numbers = #tpu.dot_dimension_numbers<[1], [0], [0], [1], [0, 0, 1, 1], [], []>} : vector<4x4xf32>, vector<4x128xf32>, vector<4x128xf32> -> vector<4x128xf32>
    %c0_20 = arith.constant 0 : index
    %c0_21 = arith.constant 0 : index
    %32 = vector.load %arg6[%c0_20, %c0_21] : memref<4x1xf32, #tpu.memory_space<vmem>>, vector<4x1xf32>
    %33 = vector.broadcast %32 : vector<4x1xf32> to vector<4x128xf32>
    %34 = arith.addf %31, %33 : vector<4x128xf32>
    %c128_i32 = arith.constant 128 : i32
    %35 = arith.muli %arg1, %c128_i32 : i32
    %36 = tpu.assume_multiple %35, 128 : i32
    %c0_i32 = arith.constant 0 : i32
    %37 = arith.cmpi eq, %arg0, %c0_i32 : i32
    %38 = arith.extui %37 : i1 to i32
    %c0_i32_22 = arith.constant 0 : i32
    %39 = arith.cmpi ne, %38, %c0_i32_22 : i32
    scf.if %39 {
      %c0_27 = arith.constant 0 : index
      %c0_28 = arith.constant 0 : index
      %48 = arith.index_cast %36 : i32 to index
      %49 = vector.load %arg9[%c0_27, %c0_28, %48] : memref<2x4x256xf32, #tpu.memory_space<vmem>>, vector<1x4x128xf32>
      %50 = vector.shape_cast %49 : vector<1x4x128xf32> to vector<4x128xf32>
      %51 = vector.shape_cast %34 : vector<4x128xf32> to vector<1x4x128xf32>
      tpu.vector_store %arg9[%c0_27, %c0_28, %48], %51 {strides = array<i32>} : memref<2x4x256xf32, #tpu.memory_space<vmem>>, vector<1x4x128xf32>,
    } else {
    }
    %c1_i32 = arith.constant 1 : i32
    %40 = arith.cmpi eq, %arg0, %c1_i32 : i32
    %41 = arith.extui %40 : i1 to i32
    %c0_i32_23 = arith.constant 0 : i32
    %42 = arith.cmpi ne, %41, %c0_i32_23 : i32
    scf.if %42 {
      %c1 = arith.constant 1 : index
      %c0_27 = arith.constant 0 : index
      %48 = arith.index_cast %36 : i32 to index
      %49 = vector.load %arg9[%c1, %c0_27, %48] : memref<2x4x256xf32, #tpu.memory_space<vmem>>, vector<1x4x128xf32>
      %50 = vector.shape_cast %49 : vector<1x4x128xf32> to vector<4x128xf32>
      %51 = vector.shape_cast %34 : vector<4x128xf32> to vector<1x4x128xf32>
      tpu.vector_store %arg9[%c1, %c0_27, %48], %51 {strides = array<i32>} : memref<2x4x256xf32, #tpu.memory_space<vmem>>, vector<1x4x128xf32>,
    } else {
    }
    %c1_i32_24 = arith.constant 1 : i32
    %43 = arith.cmpi eq, %arg0, %c1_i32_24 : i32
    %c1_i32_25 = arith.constant 1 : i32
    %44 = arith.cmpi eq, %arg1, %c1_i32_25 : i32
    %45 = arith.andi %43, %44 : i1
    %46 = arith.extui %45 : i1 to i32
    %c0_i32_26 = arith.constant 0 : i32
    %47 = arith.cmpi ne, %46, %c0_i32_26 : i32
    scf.if %47 {
      %c0_27 = arith.constant 0 : index
      %c0_28 = arith.constant 0 : index
      %c0_29 = arith.constant 0 : index
      %48 = vector.load %arg9[%c0_27, %c0_28, %c0_29] : memref<2x4x256xf32, #tpu.memory_space<vmem>>, vector<1x4x256xf32>
      %49 = vector.shape_cast %48 : vector<1x4x256xf32> to vector<4x256xf32>
      %cst_30 = arith.constant dense<0.000000e+00> : vector<4xf32>
      %50 = vector.multi_reduction <add>, %49, %cst_30 [1] : vector<4x256xf32> to vector<4xf32>
      %51 = vector.shape_cast %50 : vector<4xf32> to vector<4x1xf32>
      %c1 = arith.constant 1 : index
      %c0_31 = arith.constant 0 : index
      %c0_32 = arith.constant 0 : index
      %52 = vector.load %arg9[%c1, %c0_31, %c0_32] : memref<2x4x256xf32, #tpu.memory_space<vmem>>, vector<1x4x256xf32>
      %53 = vector.shape_cast %52 : vector<1x4x256xf32> to vector<4x256xf32>
      %cst_33 = arith.constant dense<0.000000e+00> : vector<4xf32>
      %54 = vector.multi_reduction <add>, %53, %cst_33 [1] : vector<4x256xf32> to vector<4xf32>
      %55 = vector.shape_cast %54 : vector<4xf32> to vector<4x1xf32>
      %56 = arith.addf %51, %55 : vector<4x1xf32>
      %cst_34 = arith.constant 0.001953125 : f32
      %57 = vector.broadcast %cst_34 : f32 to vector<4x1xf32>
      %58 = arith.mulf %56, %57 : vector<4x1xf32>
      %c0_35 = arith.constant 0 : index
      %c0_36 = arith.constant 0 : index
      %c0_37 = arith.constant 0 : index
      %59 = vector.load %arg9[%c0_35, %c0_36, %c0_37] : memref<2x4x256xf32, #tpu.memory_space<vmem>>, vector<1x4x256xf32>
      %60 = vector.shape_cast %59 : vector<1x4x256xf32> to vector<4x256xf32>
      %61 = vector.broadcast %58 : vector<4x1xf32> to vector<4x256xf32>
      %62 = arith.subf %60, %61 : vector<4x256xf32>
      %63 = arith.mulf %62, %62 : vector<4x256xf32>
      %cst_38 = arith.constant dense<0.000000e+00> : vector<4xf32>
      %64 = vector.multi_reduction <add>, %63, %cst_38 [1] : vector<4x256xf32> to vector<4xf32>
      %65 = vector.shape_cast %64 : vector<4xf32> to vector<4x1xf32>
      %c1_39 = arith.constant 1 : index
      %c0_40 = arith.constant 0 : index
      %c0_41 = arith.constant 0 : index
      %66 = vector.load %arg9[%c1_39, %c0_40, %c0_41] : memref<2x4x256xf32, #tpu.memory_space<vmem>>, vector<1x4x256xf32>
      %67 = vector.shape_cast %66 : vector<1x4x256xf32> to vector<4x256xf32>
      %68 = vector.broadcast %58 : vector<4x1xf32> to vector<4x256xf32>
      %69 = arith.subf %67, %68 : vector<4x256xf32>
      %70 = arith.mulf %69, %69 : vector<4x256xf32>
      %cst_42 = arith.constant dense<0.000000e+00> : vector<4xf32>
      %71 = vector.multi_reduction <add>, %70, %cst_42 [1] : vector<4x256xf32> to vector<4xf32>
      %72 = vector.shape_cast %71 : vector<4xf32> to vector<4x1xf32>
      %73 = arith.addf %65, %72 : vector<4x1xf32>
      %cst_43 = arith.constant 0.001953125 : f32
      %74 = vector.broadcast %cst_43 : f32 to vector<4x1xf32>
      %75 = arith.mulf %73, %74 : vector<4x1xf32>
      %c0_44 = arith.constant 0 : index
      %c0_45 = arith.constant 0 : index
      %76 = vector.load %arg7[%c0_44, %c0_45] : memref<4x1xf32, #tpu.memory_space<vmem>>, vector<4x1xf32>
      %cst_46 = arith.constant 9.99999974E-6 : f32
      %77 = vector.broadcast %cst_46 : f32 to vector<4x1xf32>
      %78 = arith.addf %75, %77 : vector<4x1xf32>
      %79 = math.rsqrt %78 : vector<4x1xf32>
      %80 = arith.mulf %76, %79 : vector<4x1xf32>
      %c0_47 = arith.constant 0 : index
      %c0_48 = arith.constant 0 : index
      %81 = vector.load %arg8[%c0_47, %c0_48] : memref<4x1xf32, #tpu.memory_space<vmem>>, vector<4x1xf32>
      %c0_49 = arith.constant 0 : index
      %c0_50 = arith.constant 0 : index
      %c0_51 = arith.constant 0 : index
      %82 = vector.load %arg9[%c0_49, %c0_50, %c0_51] : memref<2x4x256xf32, #tpu.memory_space<vmem>>, vector<1x4x256xf32>
      %83 = vector.shape_cast %82 : vector<1x4x256xf32> to vector<4x256xf32>
      %84 = vector.broadcast %58 : vector<4x1xf32> to vector<4x256xf32>
      %85 = arith.subf %83, %84 : vector<4x256xf32>
      %86 = vector.broadcast %80 : vector<4x1xf32> to vector<4x256xf32>
      %87 = arith.mulf %85, %86 : vector<4x256xf32>
      %88 = vector.broadcast %81 : vector<4x1xf32> to vector<4x256xf32>
      %89 = arith.addf %87, %88 : vector<4x256xf32>
      %cst_52 = arith.constant 0.000000e+00 : f32
      %90 = vector.broadcast %cst_52 : f32 to vector<4x256xf32>
      %91 = arith.cmpf oge, %89, %90 : vector<4x256xf32>
      %cst_53 = arith.constant 0.00999999977 : f32
      %92 = vector.broadcast %cst_53 : f32 to vector<4x256xf32>
      %93 = arith.mulf %89, %92 : vector<4x256xf32>
      %94 = arith.select %91, %89, %93 : vector<4x256xi1>, vector<4x256xf32>
      %c0_54 = arith.constant 0 : index
      %c0_55 = arith.constant 0 : index
      %c0_56 = arith.constant 0 : index
      %95 = vector.load %arg9[%c0_54, %c0_55, %c0_56] : memref<2x4x256xf32, #tpu.memory_space<vmem>>, vector<1x4x256xf32>
      %96 = vector.shape_cast %95 : vector<1x4x256xf32> to vector<4x256xf32>
      %97 = vector.shape_cast %94 : vector<4x256xf32> to vector<1x4x256xf32>
      tpu.vector_store %arg9[%c0_54, %c0_55, %c0_56], %97 {strides = array<i32>} : memref<2x4x256xf32, #tpu.memory_space<vmem>>, vector<1x4x256xf32>,
      %c1_57 = arith.constant 1 : index
      %c0_58 = arith.constant 0 : index
      %c0_59 = arith.constant 0 : index
      %98 = vector.load %arg9[%c1_57, %c0_58, %c0_59] : memref<2x4x256xf32, #tpu.memory_space<vmem>>, vector<1x4x256xf32>
      %99 = vector.shape_cast %98 : vector<1x4x256xf32> to vector<4x256xf32>
      %100 = vector.broadcast %58 : vector<4x1xf32> to vector<4x256xf32>
      %101 = arith.subf %99, %100 : vector<4x256xf32>
      %102 = vector.broadcast %80 : vector<4x1xf32> to vector<4x256xf32>
      %103 = arith.mulf %101, %102 : vector<4x256xf32>
      %104 = vector.broadcast %81 : vector<4x1xf32> to vector<4x256xf32>
      %105 = arith.addf %103, %104 : vector<4x256xf32>
      %cst_60 = arith.constant 0.000000e+00 : f32
      %106 = vector.broadcast %cst_60 : f32 to vector<4x256xf32>
      %107 = arith.cmpf oge, %105, %106 : vector<4x256xf32>
      %cst_61 = arith.constant 0.00999999977 : f32
      %108 = vector.broadcast %cst_61 : f32 to vector<4x256xf32>
      %109 = arith.mulf %105, %108 : vector<4x256xf32>
      %110 = arith.select %107, %105, %109 : vector<4x256xi1>, vector<4x256xf32>
      %c1_62 = arith.constant 1 : index
      %c0_63 = arith.constant 0 : index
      %c0_64 = arith.constant 0 : index
      %111 = vector.load %arg9[%c1_62, %c0_63, %c0_64] : memref<2x4x256xf32, #tpu.memory_space<vmem>>, vector<1x4x256xf32>
      %112 = vector.shape_cast %111 : vector<1x4x256xf32> to vector<4x256xf32>
      %113 = vector.shape_cast %110 : vector<4x256xf32> to vector<1x4x256xf32>
      tpu.vector_store %arg9[%c1_62, %c0_63, %c0_64], %113 {strides = array<i32>} : memref<2x4x256xf32, #tpu.memory_space<vmem>>, vector<1x4x256xf32>,
    } else {
    }
    return
  }
  func.func @transform_0(%arg0: i32, %arg1: i32) -> (i32, i32, i32) {
    %c0_i32 = arith.constant 0 : i32
    %c0_i32_0 = arith.constant 0 : i32
    %c0_i32_1 = arith.constant 0 : i32
    return %arg0, %c0_i32, %c0_i32_0 : i32, i32, i32
  }
  func.func @transform_1(%arg0: i32, %arg1: i32) -> (i32, i32, i32) {
    %c0_i32 = arith.constant 0 : i32
    %c0_i32_0 = arith.constant 0 : i32
    return %arg0, %c0_i32, %arg1 : i32, i32, i32
  }
  func.func @transform_2(%arg0: i32, %arg1: i32) -> (i32, i32) {
    %c0_i32 = arith.constant 0 : i32
    %c0_i32_0 = arith.constant 0 : i32
    %c0_i32_1 = arith.constant 0 : i32
    return %c0_i32, %c0_i32_0 : i32, i32
  }
  func.func @transform_3(%arg0: i32, %arg1: i32) -> (i32, i32) {
    %c0_i32 = arith.constant 0 : i32
    %c0_i32_0 = arith.constant 0 : i32
    %c0_i32_1 = arith.constant 0 : i32
    return %c0_i32, %c0_i32_0 : i32, i32
  }
  func.func @transform_4(%arg0: i32, %arg1: i32) -> (i32, i32) {
    %c0_i32 = arith.constant 0 : i32
    %c0_i32_0 = arith.constant 0 : i32
    %c0_i32_1 = arith.constant 0 : i32
    return %c0_i32, %c0_i32_0 : i32, i32
  }
  func.func @transform_5(%arg0: i32, %arg1: i32) -> (i32, i32) {
    %c0_i32 = arith.constant 0 : i32
    %c0_i32_0 = arith.constant 0 : i32
    %c0_i32_1 = arith.constant 0 : i32
    return %c0_i32, %c0_i32_0 : i32, i32
  }
  func.func @transform_6(%arg0: i32, %arg1: i32) -> (i32, i32) {
    %c0_i32 = arith.constant 0 : i32
    %c0_i32_0 = arith.constant 0 : i32
    %c0_i32_1 = arith.constant 0 : i32
    return %c0_i32, %c0_i32_0 : i32, i32
  }
  func.func @transform_7(%arg0: i32, %arg1: i32) -> (i32, i32, i32) {
    %c0_i32 = arith.constant 0 : i32
    %c0_i32_0 = arith.constant 0 : i32
    %c0_i32_1 = arith.constant 0 : i32
    %c0_i32_2 = arith.constant 0 : i32
    return %c0_i32, %c0_i32_0, %c0_i32_1 : i32, i32, i32
  }
  func.func @transform_8(%arg0: i32, %arg1: i32) -> (i32, i32, i32) {
    %c0_i32 = arith.constant 0 : i32
    %c0_i32_0 = arith.constant 0 : i32
    return %arg0, %arg1, %c0_i32 : i32, i32, i32
  }
}

</mosaic_0001>

<bundles_post_ra>
// kernel: attention_module_forward.1
= control target key start
LH: loop header
LB: loop body
LE: loop exit
PB: predicated region body
PF: predicated region fallthrough
CT: control target
= control target key end

     0   :  { %14 = vsyncpa [#allocation3], 0  ;;  %s2367_s0 = inlined_call_operand.vmem [shape: f32[2,4,256], index: 0, kind: input, shape index: {}, may-alias: {0,1}]   ;;  %s2368_s1 = inlined_call_operand.vmem [shape: f32[2,4,256], index: 1, kind: input, shape index: {}, may-alias: {0,1}]   ;;  %s2369_s2 = inlined_call_operand.vmem [shape: f32[64,4], index: 2, kind: input, shape index: {}]   ;;  %s2370_s3 = inlined_call_operand.vmem [shape: f32[4,4], index: 3, kind: input, shape index: {}]   ;;  %s2371_s4 = inlined_call_operand.vmem [shape: f32[4,1], index: 4, kind: input, shape index: {}]   ;;  %s2372_s5 = inlined_call_operand.vmem [shape: f32[4,1], index: 5, kind: input, shape index: {}]   ;;  %s2373_s6 = inlined_call_operand.vmem [shape: f32[4,1], index: 6, kind: input, shape index: {}]   ;;  %s2374_s7 = inlined_call_operand.vmem [shape: f32[2,4,256], index: 7, kind: output, shape index: {0}]   ;;  %s2375_s8 = inlined_call_operand.hbm [shape: f32[2,256,256], index: 8, kind: output, shape index: {1}]  }
   0x1   :  { %16 = vsyncpa [#allocation3 + $0x1], 0  ;;  %s1781_s27 = smov 0   ;;  %s1783_s28 = smov 0  }
   0x2   :  { %s1785_s29 = smov 0   ;;  %s1787_s30 = smov 0  }
   0x3   :  { %s1789_s9 = smov 0   ;;  %s1791_s10 = smov 0  }
   0x4   :  { %s1793_s11 = smov 0   ;;  %s1795_s12 = smov 0  }
   0x5 LB: > { %2380 = sst [smem:[#allocation5_spill]] %s1721_s10  ;;  %s1379_s13 = sadd.s32 4294967295, %s1729_s12   ;;  %s1729_s12 = sphi %s1795_s12, %s22_s12   ;;  %s1725_s11 = sphi %s1793_s11, %s2391_s11   ;;  %s1721_s10 = sphi %s1791_s10, %s2390_s10   ;;  %s1717_s9 = sphi %s1789_s9, %s2389_s9   ;;  %s1713_s30 = sphi %s1787_s30, %s2388_s30   ;;  %s1709_s29 = sphi %s1785_s29, %s2394_s29   ;;  %s1705_s28 = sphi %s1783_s28, %s2393_s28   ;;  %s1701_s27 = sphi %s1781_s27, %s2392_s27  }
   0x6   : > { %2381 = sst [smem:[#allocation6_spill]] %s1725_s11  ;;  %s1380_s14 = sadd.s32 4294967294, %s1729_s12  }
   0x7   : > { %s31_s15 = sadd.s32 1, %s1721_s10  ;;  %s34_s16 = sadd.s32 1, %s1725_s11 }
   0x8   : > { %p32_p0 = scmp.ge.s32.totalorder %s31_s15, 2  ;;  %p233_p1 = scmp.ne.s32.totalorder %s1709_s29, %s1705_s28 }
   0x9   : > { %p234_p2 = scmp.eq.s32.totalorder %s1379_s13, 3  ;;  %p239_p5 = scmp.ne.s32.totalorder %s1705_s28, %s1701_s27 }
   0xa   : > { %s2396_s15 = smov (%p32_p0, %s31_s15), 0  ;;  %s2398_s16 = smov (!%p32_p0, %s34_s16), %s1725_s11 }
   0xb   : > { %2382 = sst [smem:[#allocation7_spill]] %s2396_s15  ;;  %s219_s17 = ssub.s32 %s1721_s10, %s2396_s15 }
   0xc   : > { %p1832_p3 = por %p234_p2, %p233_p1  ;;  %p36_p4 = scmp.ge.s32.totalorder %s2398_s16, 2 }
   0xd   : > { %p240_p6 = scmp.eq.s32.totalorder %s1380_s14, 3  ;;  %p1383_p7 = scmp.ge.s32.totalorder %s1729_s12, 1 }
   0xe   : > { %s2400_s16 = smov (%p36_p4, %s2398_s16), 0  ;;  %p292_p9 = scmp.lt.s32.totalorder %s1729_s12, 5 }
   0xf   : > { %2384 = sst [smem:[#allocation8_spill]] %s2400_s16  ;;  %p1841_p8 = por %p240_p6, %p239_p5 }
  0x10   : > { %s218_s20 = ssub.s32 %s1725_s11, %s2400_s16  ;;  %s223_s21 = sadd.s32 1, %s1709_s29 }
  0x11   : > { %s220_s22 = sor.u32 %s219_s17, %s218_s20  ;;  %p293_p10 = pnand %p1383_p7, %p292_p9 }
  0x12   : > { %p221_p11 = scmp.eq.s32.totalorder %s220_s22, 0  ;;  %p334_p12 = scmp.lt.s32.totalorder (!%p293_p10), %s1717_s9, 1 }
  0x13   : > { %296 = sbr.rel (%p293_p10) target bundleno = 1679 (0x68f), region = 48  ;;  %p341_p13 = scmp.lt.s32.totalorder (!%p293_p10), %s1713_s30, 1 }
  0x14   : > { %s1850_s23 = scalar_select %p221_p11, %s1709_s29, %s223_s21  }
  0x15   : > { %s331_s15 = sand.u32 (!%p293_p10), 1, %s1705_s28   ;;  %p1439_p0 = scmp.ne.s32.totalorder (!%p293_p10), %s1717_s9, 0 }
  0x16   : > { %2386 = sst [smem:[#allocation9_spill]] %s1850_s23 }
  0x18   : > { %s335_s24 = scalar_select %p334_p12, %s1717_s9, 1  ;;  %vm375_vm0 = vcmask 1043456   ;;  %v354_v1 = vld [vmem:[%s2369_s2 + $0x20] sm:$0xff]  ;;  %vm362_vm1 = vcmask 31744   ;;  %v355_v4 = vld [vmem:[%s2369_s2 + $0x28] sm:$0xff]  ;;  %v356_v5 = vld [vmem:[%s2369_s2 + $0x30] sm:$0xff] }
  0x19   : > { %s342_s25 = scalar_select %p341_p13, %s1713_s30, 1  ;;  %v357_v6 = vld [vmem:[%s2369_s2 + $0x38] sm:$0xff]  ;;  %v350_v7 = vld [vmem:[%s2369_s2] sm:$0xff]  ;;  %v351_v8 = vld [vmem:[%s2369_s2 + $0x8] sm:$0xff]  ;;  %vm514_vm2 = vcmask 261120  }
  0x1a   : > { %s1454_s26 = sshll.u32 %s335_s24, 3  ;;  %s1387_s13 = sshll.u32 %s335_s24, 1  ;;  %v352_v9 = vld [vmem:[%s2369_s2 + $0x10] sm:$0xff]  ;;  %v353_v10 = vld [vmem:[%s2369_s2 + $0x18] sm:$0xff] }
  0x1b   : > { %s338_s16 = scalar_lea.vmem %s2367_s0, %s1454_s26  ;;  %s344_s17 = sadd.s32 %s1387_s13, %s342_s25 }
  0x1c   : > { %v348_v0 = vld [vmem:[%s338_s16] sm:$0xff]  ;;  %s1388_s20 = sshll.u32 %s344_s17, 2  ;;  %s1384_s16 = sshll.u32 %s331_s15, 8 }
  0x1d   : > { %359 = vst [vmem:[#allocation1] ss:$2 sm:$0xff] %v348_v0  ;;  %s346_s11 = scalar_lea.vmem %s2368_s1, %s1388_s20  ;;  %s2192_s24 = scalar_lea.vmem [#allocation2], %s1384_s16 }
  0x1e   : > { %v349_v3 = vld [vmem:[%s346_s11] sm:$0xf]  ;;  %s1438_s26 = sshll.u32 %s1713_s30, 7 }
  0x1f   : > { %s1128_s13 = sshra.s32 (!%p1439_p0), %s1438_s26, 7 }
  0x20   : > { %s1440_s14 = sshll.u32 (!%p1439_p0), %s1128_s13, 2 }
  0x21   : > { %s1131_s21 = scalar_lea.vmem (!%p1439_p0), %s2374_s7, %s1440_s14 }
  0x24   : > { %v360_v2 = vld.sshfl [vmem:[#allocation1] sm:$0xff pattern:$0x75316420]  ;;  %v361_v11 = vld.sshfl [vmem:[#allocation1 + $0x8] sm:$0xff pattern:$0x75316420] }
  0x25   : > { %1389 = vmatpush.msk.msra.mxu2 %vm375_vm0, %v360_v2  ;;  %1394 = vmatpush.msk.msra.mxu1 %vm375_vm0, %v361_v11  ;;  %1045 = vst [vmem:[#allocation1] ss:$2 sm:$0xff] %v348_v0 }
  0x26   : > { %1390 = vmatmul.msk.f32.vlgmr.msra.gmra.mxu2 %vm362_vm1, %v354_v1  ;;  %1395 = vmatmul.msk.f32.vlgmr.msra.gmra.mxu1 %vm362_vm1, %v354_v1 }
  0x27   : > { %1399 = vmatpush.msk.msrb.mxu2 %vm375_vm0, %v349_v3 }
  0x2e   : > { %1391 = vmatmul.msk.f32.gmra.mxu2 %vm362_vm1, %v355_v4  ;;  %1396 = vmatmul.msk.f32.gmra.mxu1 %vm362_vm1, %v355_v4 }
  0x36   : > { %1392 = vmatmul.msk.f32.gmra.mxu2 %vm362_vm1, %v356_v5  ;;  %1397 = vmatmul.msk.f32.gmra.mxu1 %vm362_vm1, %v356_v5 }
  0x3e   : > { %1393 = vmatmul.msk.f32.gmra.mxu2 %vm362_vm1, %v357_v6  ;;  %1398 = vmatmul.msk.f32.gmra.mxu1 %vm362_vm1, %v357_v6 }
  0x46   : > { %1400 = vmatmul.msk.f32.vlgmr.msrb.gmra.mxu2 %vm362_vm1, %v350_v7 }
  0x4e   : > { %1401 = vmatmul.msk.f32.gmra.mxu2 %vm362_vm1, %v351_v8 }
  0x56   : > { %1402 = vmatmul.msk.f32.gmra.mxu2 %vm362_vm1, %v352_v9 }
  0x5e   : > { %1403 = vmatmul.msk.f32.gmra.mxu2 %vm362_vm1, %v353_v10 }
  0xa3   : > { %v426_v20 = vpop.f32.mrf.mxu1 }
  0xa9   : > { %v397_v12 = vpop.f32.mrf.mxu2 }
  0xab   : > { %v429_v21 = vpop.f32.mrf.mxu1 }
  0xb1   : > { %v400_v13 = vpop.f32.mrf.mxu2 }
  0xb3   : > { %v432_v22 = vpop.f32.mrf.mxu1 }
  0xb9   : > { %v403_v14 = vpop.f32.mrf.mxu2 }
  0xbb   : > { %v435_v23 = vpop.f32.mrf.mxu1 }
  0xbc   : > { %640 = vmatpush.msra.mxu0 %v435_v23 }
  0xbe   : > { %641 = vmatpush.msra.mxu0 %v432_v22 }
  0xc0   : > { %642 = vmatpush.msra.mxu0 %v429_v21 }
  0xc1   : > { %v406_v15 = vpop.f32.mrf.mxu2 }
  0xc2   : > { %575 = vmatpush.msra.mxu3 %v406_v15  ;;  %643 = vmatpush.msra.mxu0 %v426_v20 }
  0xc4   : > { %576 = vmatpush.msra.mxu3 %v403_v14 }
  0xc6   : > { %577 = vmatpush.msra.mxu3 %v400_v13 }
  0xc8   : > { %578 = vmatpush.msra.mxu3 %v397_v12 }
  0xc9   : > { %v470_v16 = vpop.f32.mrf.mxu2 }
  0xca   : > { %482 = vxpose.xlu0.b32.start [1/4] (short) %v470_v16, 128 }
  0xd1   : > { %v473_v17 = vpop.f32.mrf.mxu2 }
  0xd2   : > { %483 = vxpose.xlu0.b32.cont [2/4] (short) %v473_v17, 128 }
  0xd9   : > { %v476_v18 = vpop.f32.mrf.mxu2 }
  0xda   : > { %484 = vxpose.xlu0.b32.cont [3/4] (short) %v476_v18, 128 }
  0xe1   : > { %v479_v19 = vpop.f32.mrf.mxu2 }
  0xe2   : > { %485 = vxpose.xlu0.b32.end [4/4] (short) %v479_v19, 128 }
 0x16e   : > { %v498_v24 = vpop.trf.xlu0 }
 0x16f   : > { %1404 = vmatmul.msk.f32.vlgmr.msra.gmra.mxu3 %vm514_vm2, %v498_v24  ;;  %1420 = vmatmul.msk.f32.vlgmr.msra.gmra.mxu0 %vm514_vm2, %v498_v24 }
 0x176   : > { %v499_v25 = vpop.trf.xlu0 }
 0x177   : > { %1405 = vmatmul.msk.f32.gmra.mxu3 %vm514_vm2, %v499_v25  ;;  %1421 = vmatmul.msk.f32.gmra.mxu0 %vm514_vm2, %v499_v25 }
 0x17e   : > { %v500_v26 = vpop.trf.xlu0 }
 0x17f   : > { %1406 = vmatmul.msk.f32.gmra.mxu3 %vm514_vm2, %v500_v26  ;;  %1422 = vmatmul.msk.f32.gmra.mxu0 %vm514_vm2, %v500_v26 }
 0x186   : > { %v501_v27 = vpop.trf.xlu0 }
 0x187   : > { %1407 = vmatmul.msk.f32.gmra.mxu3 %vm514_vm2, %v501_v27  ;;  %1423 = vmatmul.msk.f32.gmra.mxu0 %vm514_vm2, %v501_v27 }
 0x18e   : > { %v502_v28 = vpop.trf.xlu0 }
 0x18f   : > { %1408 = vmatmul.msk.f32.gmra.mxu3 %vm514_vm2, %v502_v28  ;;  %1424 = vmatmul.msk.f32.gmra.mxu0 %vm514_vm2, %v502_v28 }
 0x196   : > { %v503_v29 = vpop.trf.xlu0 }
 0x197   : > { %1409 = vmatmul.msk.f32.gmra.mxu3 %vm514_vm2, %v503_v29  ;;  %1425 = vmatmul.msk.f32.gmra.mxu0 %vm514_vm2, %v503_v29 }
 0x19e   : > { %v504_v30 = vpop.trf.xlu0 }
 0x19f   : > { %1410 = vmatmul.msk.f32.gmra.mxu3 %vm514_vm2, %v504_v30  ;;  %1426 = vmatmul.msk.f32.gmra.mxu0 %vm514_vm2, %v504_v30 }
 0x1a6   : > { %v505_v31 = vpop.trf.xlu0 }
 0x1a7   : > { %1411 = vmatmul.msk.f32.gmra.mxu3 %vm514_vm2, %v505_v31  ;;  %1427 = vmatmul.msk.f32.gmra.mxu0 %vm514_vm2, %v505_v31 }
 0x1ae   : > { %v506_v32 = vpop.trf.xlu0 }
 0x1af   : > { %1412 = vmatmul.msk.f32.gmra.mxu3 %vm514_vm2, %v506_v32  ;;  %1428 = vmatmul.msk.f32.gmra.mxu0 %vm514_vm2, %v506_v32 }
 0x1b6   : > { %v507_v33 = vpop.trf.xlu0 }
 0x1b7   : > { %1413 = vmatmul.msk.f32.gmra.mxu3 %vm514_vm2, %v507_v33  ;;  %1429 = vmatmul.msk.f32.gmra.mxu0 %vm514_vm2, %v507_v33 }
 0x1be   : > { %v508_v34 = vpop.trf.xlu0 }
 0x1bf   : > { %1414 = vmatmul.msk.f32.gmra.mxu3 %vm514_vm2, %v508_v34  ;;  %1430 = vmatmul.msk.f32.gmra.mxu0 %vm514_vm2, %v508_v34 }
 0x1c6   : > { %v509_v35 = vpop.trf.xlu0 }
 0x1c7   : > { %1415 = vmatmul.msk.f32.gmra.mxu3 %vm514_vm2, %v509_v35  ;;  %1431 = vmatmul.msk.f32.gmra.mxu0 %vm514_vm2, %v509_v35 }
 0x1ce   : > { %v510_v36 = vpop.trf.xlu0 }
 0x1cf   : > { %1416 = vmatmul.msk.f32.gmra.mxu3 %vm514_vm2, %v510_v36  ;;  %1432 = vmatmul.msk.f32.gmra.mxu0 %vm514_vm2, %v510_v36 }
 0x1d6   : > { %v511_v37 = vpop.trf.xlu0 }
 0x1d7   : > { %1417 = vmatmul.msk.f32.gmra.mxu3 %vm514_vm2, %v511_v37  ;;  %1433 = vmatmul.msk.f32.gmra.mxu0 %vm514_vm2, %v511_v37 }
 0x1de   : > { %v512_v38 = vpop.trf.xlu0 }
 0x1df   : > { %1418 = vmatmul.msk.f32.gmra.mxu3 %vm514_vm2, %v512_v38  ;;  %1434 = vmatmul.msk.f32.gmra.mxu0 %vm514_vm2, %v512_v38 }
 0x1e6   : > { %v513_v39 = vpop.trf.xlu0 }
 0x1e7   : > { %1419 = vmatmul.msk.f32.gmra.mxu3 %vm514_vm2, %v513_v39  ;;  %1435 = vmatmul.msk.f32.gmra.mxu0 %vm514_vm2, %v513_v39 }
 0x1ec   : > { %v1933_v40 = vpop.f32.mrf.mxu0 }
 0x1f2   : > { %v1935_v41 = vpop.f32.mrf.mxu3 }
 0x1f4   : > { %v1937_v42 = vpop.f32.mrf.mxu0 }
 0x1fa   : > { %v1939_v43 = vpop.f32.mrf.mxu3 }
 0x1fc   : > { %v1941_v44 = vpop.f32.mrf.mxu0 }
 0x202   : > { %v1943_v45 = vpop.f32.mrf.mxu3 }
 0x204   : > { %v1945_v46 = vpop.f32.mrf.mxu0 }
 0x205   : > { %v2009_v37 = vmul.f32 0.17677669, %v1945_v46 }
 0x20a   : > { %v589_v47 = vpop.f32.mrf.mxu3 }
 0x20b   : > { %v2004_v35 = vmul.f32 0.17677669, %v589_v47 }
 0x20c   : > { %v1947_v48 = vpop.f32.mrf.mxu0 }
 0x20d   : > { %v734_v39 = vmax.f32 %v2004_v35, %v2009_v37 }
 0x212   : > { %v1949_v49 = vpop.f32.mrf.mxu3 }
 0x213   : > { %v2025_v46 = vmul.f32 0.17677669, %v1949_v49  ;;  %v2041_v49 = vmul.f32 0.17677669, %v1939_v43 }
 0x214   : > { %v660_v50 = vpop.f32.mrf.mxu0 }
 0x215   : > { %v1996_v31 = vmul.f32 0.17677669, %v660_v50 }
 0x21a   : > { %v595_v51 = vpop.f32.mrf.mxu3 }
 0x21b   : > { %v1992_v29 = vmul.f32 0.17677669, %v595_v51 }
 0x21c   : > { %v1951_v52 = vpop.f32.mrf.mxu0 }
 0x21d   : > { %v740_v33 = vmax.f32 %v1992_v29, %v1996_v31  ;;  %v2020_v47 = vmul.f32 0.17677669, %v1951_v52  ;;  %v2036_v52 = vmul.f32 0.17677669, %v1941_v44  ;;  %v2052_v44 = vmul.f32 0.17677669, %v1933_v40 }
 0x222   : > { %v598_v53 = vpop.f32.mrf.mxu3 }
 0x223   : > { %v2017_v51 = vmul.f32 0.17677669, %v598_v53  ;;  %v2033_v53 = vmul.f32 0.17677669, %v1943_v45  ;;  %v2049_v45 = vmul.f32 0.17677669, %v1935_v41 }
 0x224   : > { %v666_v54 = vpop.f32.mrf.mxu0 }
 0x225   : > { %v1953_v56 = vmul.f32 0.17677669, %v666_v54  ;;  %v743_v54 = vmax.f32 %v2017_v51, %v2020_v47 }
 0x22a   : > { %v601_v55 = vpop.f32.mrf.mxu3 }
 0x22b   : > { %v1955_v57 = vmul.f32 0.17677669, %v601_v55  ;;  %v2028_v55 = vmul.f32 0.17677669, %v1947_v48  ;;  %v2044_v48 = vmul.f32 0.17677669, %v1937_v42 }
 0x22c   : > { %v669_v58 = vpop.f32.mrf.mxu0 }
 0x22d   : > { %v746_v59 = vmax.f32 %v1955_v57, %v1953_v56  ;;  %v1984_v25 = vmul.f32 0.17677669, %v669_v58  ;;  %v737_v58 = vmax.f32 %v2025_v46, %v2028_v55 }
 0x22f   : > { %747 = vmax.xlane.f32.xlu0 %v746_v59  ;;  %v731_v59 = vmax.f32 %v2033_v53, %v2036_v52 }
 0x232   : > { %v604_v60 = vpop.f32.mrf.mxu3 }
 0x233   : > { %v1980_v23 = vmul.f32 0.17677669, %v604_v60  ;;  %v728_v60 = vmax.f32 %v2041_v49, %v2044_v48 }
 0x234   : > { %v672_v61 = vpop.f32.mrf.mxu0 }
 0x235   : > { %v749_v27 = vmax.f32 %v1980_v23, %v1984_v25  ;;  %v2011_v38 = vmul.f32 0.17677669, %v672_v61  ;;  %v725_v61 = vmax.f32 %v2049_v45, %v2052_v44 }
 0x23a   : > { %v607_v62 = vpop.f32.mrf.mxu3 }
 0x23b   : > { %v2006_v36 = vmul.f32 0.17677669, %v607_v62 }
 0x23c   : > { %v675_v63 = vpop.f32.mrf.mxu0 }
 0x23d   : > { %v1970_v18 = vmul.f32 0.17677669, %v675_v63  ;;  %v752_v50 = vmax.f32 %v2006_v36, %v2011_v38 }
 0x242   : > { %v610_v0 = vpop.f32.mrf.mxu3 }
 0x243   : > { %v1968_v16 = vmul.f32 0.17677669, %v610_v0 }
 0x244   : > { %v678_v1 = vpop.f32.mrf.mxu0 }
 0x245   : > { %v755_v21 = vmax.f32 %v1968_v16, %v1970_v18  ;;  %v1998_v32 = vmul.f32 0.17677669, %v678_v1 }
 0x24a   : > { %v613_v2 = vpop.f32.mrf.mxu3 }
 0x24b   : > { %v1994_v30 = vmul.f32 0.17677669, %v613_v2 }
 0x24c   : > { %v681_v3 = vpop.f32.mrf.mxu0 }
 0x24d   : > { %v718_v13 = vmul.f32 0.17677669, %v681_v3  ;;  %v758_v34 = vmax.f32 %v1994_v30, %v1998_v32 }
 0x252   : > { %v616_v4 = vpop.f32.mrf.mxu3 }
 0x253   : > { %v1965_v11 = vmul.f32 0.17677669, %v616_v4 }
 0x254   : > { %v684_v5 = vpop.f32.mrf.mxu0 }
 0x255   : > { %v1959_v7 = vmul.f32 0.17677669, %v684_v5  ;;  %v761_v14 = vmax.f32 %v1965_v11, %v718_v13 }
 0x25a   : > { %v619_v6 = vpop.f32.mrf.mxu3 }
 0x25b   : > { %v1961_v8 = vmul.f32 0.17677669, %v619_v6 }
 0x25c   : > { %v687_v10 = vpop.f32.mrf.mxu0 }
 0x25d   : > { %v764_v9 = vmax.f32 %v1961_v8, %v1959_v7  ;;  %v1986_v26 = vmul.f32 0.17677669, %v687_v10 }
 0x25f   : > { %765 = vmax.xlane.f32.xlu2 %v764_v9 }
 0x262   : > { %v622_v12 = vpop.f32.mrf.mxu3 }
 0x263   : > { %v1982_v24 = vmul.f32 0.17677669, %v622_v12 }
 0x264   : > { %v690_v15 = vpop.f32.mrf.mxu0 }
 0x265   : > { %v1972_v19 = vmul.f32 0.17677669, %v690_v15  ;;  %v767_v28 = vmax.f32 %v1982_v24, %v1986_v26 }
 0x267   : > { %762 = vmax.xlane.f32.xlu2 %v761_v14 }
 0x26a   : > { %v625_v17 = vpop.f32.mrf.mxu3 }
 0x26b   : > { %v1974_v20 = vmul.f32 0.17677669, %v625_v17 }
 0x26d   : > { %v770_v22 = vmax.f32 %v1974_v20, %v1972_v19 }
 0x26f   : > { %756 = vmax.xlane.f32.xlu2 %v755_v21  ;;  %771 = vmax.xlane.f32.xlu1 %v770_v22 }
 0x277   : > { %750 = vmax.xlane.f32.xlu2 %v749_v27  ;;  %768 = vmax.xlane.f32.xlu1 %v767_v28 }
 0x27f   : > { %741 = vmax.xlane.f32.xlu2 %v740_v33  ;;  %759 = vmax.xlane.f32.xlu1 %v758_v34 }
 0x287   : > { %735 = vmax.xlane.f32.xlu2 %v734_v39  ;;  %753 = vmax.xlane.f32.xlu1 %v752_v50 }
 0x28f   : > { %744 = vmax.xlane.f32.xlu1 %v743_v54 }
 0x297   : > { %738 = vmax.xlane.f32.xlu1 %v737_v58 }
 0x29f   : > { %732 = vmax.xlane.f32.xlu1 %v731_v59 }
 0x2a7   : > { %729 = vmax.xlane.f32.xlu1 %v728_v60 }
 0x2af   : > { %726 = vmax.xlane.f32.xlu1 %v725_v61 }
 0x2d2   : > { %v766_v62 = vpop.xlane.xlu2 %765 }
 0x2d3   : > { %v800_v59 = vsub.f32 %v1959_v7, %v766_v62 }
 0x2da   : > { %v763_v43 = vpop.xlane.xlu2 %762 }
 0x2db   : > { %v797_v63 = vsub.f32 %v1965_v11, %v763_v43  ;;  %v798_v42 = vsub.f32 %v718_v13, %v763_v43 }
 0x2dd   : > { %v853_v0 = vmul.f32 1.442695, %v797_v63  ;;  %v855_v1 = vmul.f32 1.442695, %v798_v42  ;;  %v859_v63 = vmul.f32 1.442695, %v800_v59 }
 0x2df   : > { %1535 = vpow2.f32 %v853_v0 }
 0x2e0   : > { %1537 = vpow2.f32 %v855_v1 }
 0x2e2   : > { %v757_v2 = vpop.xlane.xlu2 %756  ;;  %v772_v3 = vpop.xlane.xlu1 %771 }
 0x2e3   : > { %v793_v41 = vsub.f32 %v1968_v16, %v757_v2  ;;  %v794_v40 = vsub.f32 %v1970_v18, %v757_v2  ;;  %v803_v33 = vsub.f32 %v1974_v20, %v772_v3  ;;  %v799_v20 = vsub.f32 %v1961_v8, %v766_v62 }
 0x2e5   : > { %v2059_v4 = vpop.eup %1535  ;;  %v845_v5 = vmul.f32 1.442695, %v793_v41  ;;  %v847_v6 = vmul.f32 1.442695, %v794_v40  ;;  %v857_v43 = vmul.f32 1.442695, %v799_v20 }
 0x2e6   : > { %v2061_v9 = vpop.eup %1537 }
 0x2e7   : > { %1539 = vpow2.f32 %v845_v5  ;;  %v905_v10 = vadd.f32 %v2061_v9, %v2059_v4 }
 0x2e8   : > { %1541 = vpow2.f32 %v847_v6 }
 0x2e9   : > { %906 = vadd.xlane.f32.xlu1 %v905_v10 }
 0x2ea   : > { %v751_v11 = vpop.xlane.xlu2 %750  ;;  %v769_v12 = vpop.xlane.xlu1 %768 }
 0x2eb   : > { %v789_v13 = vsub.f32 %v1980_v23, %v751_v11  ;;  %v790_v14 = vsub.f32 %v1984_v25, %v751_v11  ;;  %v801_v15 = vsub.f32 %v1982_v24, %v769_v12  ;;  %v802_v16 = vsub.f32 %v1986_v26, %v769_v12 }
 0x2ec   : > { %v804_v25 = vsub.f32 %v1972_v19, %v772_v3  ;;  %v865_v26 = vmul.f32 1.442695, %v803_v33 }
 0x2ed   : > { %v2069_v17 = vpop.eup %1539  ;;  %v837_v18 = vmul.f32 1.442695, %v789_v13  ;;  %v839_v21 = vmul.f32 1.442695, %v790_v14  ;;  %v861_v22 = vmul.f32 1.442695, %v801_v15  ;;  %v748_v13 = vpop.xlane.xlu0 %747 }
 0x2ee   : > { %v2071_v27 = vpop.eup %1541  ;;  %v863_v28 = vmul.f32 1.442695, %v802_v16  ;;  %v867_v34 = vmul.f32 1.442695, %v804_v25 }
 0x2ef   : > { %1543 = vpow2.f32 %v837_v18  ;;  %v899_v23 = vadd.f32 %v2071_v27, %v2069_v17 }
 0x2f0   : > { %1545 = vpow2.f32 %v839_v21 }
 0x2f1   : > { %1547 = vpow2.f32 %v861_v22  ;;  %900 = vadd.xlane.f32.xlu1 %v899_v23  ;;  %v788_v23 = vsub.f32 %v1953_v56, %v748_v13 }
 0x2f2   : > { %1549 = vpow2.f32 %v863_v28  ;;  %v760_v24 = vpop.xlane.xlu1 %759  ;;  %v742_v25 = vpop.xlane.xlu2 %741 }
 0x2f3   : > { %1551 = vpow2.f32 %v865_v26  ;;  %v795_v8 = vsub.f32 %v1994_v30, %v760_v24  ;;  %v796_v1 = vsub.f32 %v1998_v32, %v760_v24 }
 0x2f4   : > { %1553 = vpow2.f32 %v867_v34 }
 0x2f5   : > { %v2077_v39 = vpop.eup %1543  ;;  %1555 = vpow2.f32 %v857_v43  ;;  %v849_v7 = vmul.f32 1.442695, %v795_v8  ;;  %v851_v2 = vmul.f32 1.442695, %v796_v1 }
 0x2f6   : > { %v2079_v50 = vpop.eup %1545  ;;  %1557 = vpow2.f32 %v859_v63  ;;  %v783_v63 = vsub.f32 %v1992_v29, %v742_v25 }
 0x2f7   : > { %v2081_v54 = vpop.eup %1547  ;;  %v893_v58 = vadd.f32 %v2079_v50, %v2077_v39  ;;  %1559 = vpow2.f32 %v849_v7 }
 0x2f8   : > { %v2086_v19 = vpop.eup %1549  ;;  %1561 = vpow2.f32 %v851_v2  ;;  %v825_v2 = vmul.f32 1.442695, %v783_v63 }
 0x2f9   : > { %894 = vadd.xlane.f32.xlu1 %v893_v58  ;;  %v911_v60 = vadd.f32 %v2086_v19, %v2081_v54  ;;  %v2091_v42 = vpop.eup %1551 }
 0x2fa   : > { %v754_v61 = vpop.xlane.xlu1 %753  ;;  %v2094_v0 = vpop.eup %1553 }
 0x2fb   : > { %912 = vadd.xlane.f32.xlu2 %v911_v60  ;;  %v914_v62 = vadd.f32 %v2094_v0, %v2091_v42  ;;  %v2101_v5 = vpop.eup %1555  ;;  %v791_v30 = vsub.f32 %v2006_v36, %v754_v61  ;;  %v792_v11 = vsub.f32 %v2011_v38, %v754_v61  ;;  %v787_v38 = vsub.f32 %v1955_v57, %v748_v13  ;;  %v736_v1 = vpop.xlane.xlu2 %735 }
 0x2fc   : > { %v2104_v10 = vpop.eup %1557  ;;  %v835_v57 = vmul.f32 1.442695, %v788_v23 }
 0x2fd   : > { %v841_v12 = vmul.f32 1.442695, %v791_v30  ;;  %v2109_v15 = vpop.eup %1559 }
 0x2fe   : > { %v2113_v18 = vpop.eup %1561 }
 0x2ff   : > { %v902_v24 = vadd.f32 %v2113_v18, %v2109_v15 }
 0x302   : > { %v745_v3 = vpop.xlane.xlu1 %744 }
 0x303   : > { %915 = vadd.xlane.f32.xlu2 %v914_v62  ;;  %v785_v41 = vsub.f32 %v2017_v51, %v745_v3  ;;  %v786_v40 = vsub.f32 %v2020_v47, %v745_v3  ;;  %v908_v51 = vadd.f32 %v2104_v10, %v2101_v5  ;;  %v843_v47 = vmul.f32 1.442695, %v792_v11 }
 0x305   : > { %v829_v6 = vmul.f32 1.442695, %v785_v41  ;;  %v831_v32 = vmul.f32 1.442695, %v786_v40  ;;  %v779_v40 = vsub.f32 %v2004_v35, %v736_v1 }
 0x307   : > { %1563 = vpow2.f32 %v829_v6 }
 0x308   : > { %1565 = vpow2.f32 %v831_v32  ;;  %v817_v32 = vmul.f32 1.442695, %v779_v40 }
 0x309   : > { %1567 = vpow2.f32 %v841_v12 }
 0x30a   : > { %v739_v14 = vpop.xlane.xlu1 %738  ;;  %1569 = vpow2.f32 %v843_v47 }
 0x30b   : > { %909 = vadd.xlane.f32.xlu2 %v908_v51  ;;  %v781_v36 = vsub.f32 %v2025_v46, %v739_v14  ;;  %v782_v16 = vsub.f32 %v2028_v55, %v739_v14  ;;  %v833_v55 = vmul.f32 1.442695, %v787_v38 }
 0x30d   : > { %v2115_v21 = vpop.eup %1563  ;;  %v821_v22 = vmul.f32 1.442695, %v781_v36  ;;  %v823_v28 = vmul.f32 1.442695, %v782_v16 }
 0x30e   : > { %v2118_v33 = vpop.eup %1565 }
 0x30f   : > { %1571 = vpow2.f32 %v821_v22  ;;  %v887_v46 = vadd.f32 %v2118_v33, %v2115_v21  ;;  %v2125_v34 = vpop.eup %1567 }
 0x310   : > { %1573 = vpow2.f32 %v823_v28  ;;  %v2129_v58 = vpop.eup %1569 }
 0x311   : > { %888 = vadd.xlane.f32.xlu1 %v887_v46  ;;  %1575 = vpow2.f32 %v833_v55 }
 0x312   : > { %v733_v26 = vpop.xlane.xlu1 %732  ;;  %1577 = vpow2.f32 %v835_v57 }
 0x313   : > { %903 = vadd.xlane.f32.xlu2 %v902_v24  ;;  %v777_v20 = vsub.f32 %v2033_v53, %v733_v26  ;;  %v778_v56 = vsub.f32 %v2036_v52, %v733_v26  ;;  %v784_v53 = vsub.f32 %v1996_v31, %v742_v25  ;;  %v896_v52 = vadd.f32 %v2129_v58, %v2125_v34 }
 0x314   : > { %v780_v31 = vsub.f32 %v2009_v37, %v736_v1 }
 0x315   : > { %v2131_v59 = vpop.eup %1571  ;;  %v813_v60 = vmul.f32 1.442695, %v777_v20  ;;  %v815_v61 = vmul.f32 1.442695, %v778_v56  ;;  %v827_v29 = vmul.f32 1.442695, %v784_v53 }
 0x316   : > { %v2133_v43 = vpop.eup %1573  ;;  %v819_v12 = vmul.f32 1.442695, %v780_v31 }
 0x317   : > { %1579 = vpow2.f32 %v813_v60  ;;  %v881_v8 = vadd.f32 %v2133_v43, %v2131_v59  ;;  %v2141_v62 = vpop.eup %1575 }
 0x318   : > { %1581 = vpow2.f32 %v815_v61  ;;  %v2143_v3 = vpop.eup %1577 }
 0x319   : > { %882 = vadd.xlane.f32.xlu1 %v881_v8  ;;  %1583 = vpow2.f32 %v825_v2  ;;  %v890_v11 = vadd.f32 %v2143_v3, %v2141_v62 }
 0x31a   : > { %v730_v7 = vpop.xlane.xlu1 %729  ;;  %1585 = vpow2.f32 %v827_v29 }
 0x31b   : > { %897 = vadd.xlane.f32.xlu2 %v896_v52  ;;  %1587 = vpow2.f32 %v817_v32  ;;  %v775_v16 = vsub.f32 %v2041_v49, %v730_v7  ;;  %v776_v38 = vsub.f32 %v2044_v48, %v730_v7 }
 0x31c   : > { %1589 = vpow2.f32 %v819_v12 }
 0x31d   : > { %v2145_v41 = vpop.eup %1579  ;;  %v811_v23 = vmul.f32 1.442695, %v776_v38 }
 0x31e   : > { %v2148_v30 = vpop.eup %1581 }
 0x31f   : > { %v875_v6 = vadd.f32 %v2148_v30, %v2145_v41  ;;  %v2157_v47 = vpop.eup %1583 }
 0x320   : > { %v2159_v36 = vpop.eup %1585 }
 0x321   : > { %876 = vadd.xlane.f32.xlu1 %v875_v6  ;;  %v884_v22 = vadd.f32 %v2159_v36, %v2157_v47 }
 0x322   : > { %v727_v51 = vpop.xlane.xlu1 %726 }
 0x323   : > { %891 = vadd.xlane.f32.xlu2 %v890_v11  ;;  %v773_v13 = vsub.f32 %v2049_v45, %v727_v51  ;;  %v774_v35 = vsub.f32 %v2052_v44, %v727_v51  ;;  %v2165_v45 = vpop.eup %1587  ;;  %v809_v44 = vmul.f32 1.442695, %v775_v16 }
 0x324   : > { %v2167_v28 = vpop.eup %1589 }
 0x325   : > { %v805_v37 = vmul.f32 1.442695, %v773_v13  ;;  %v807_v14 = vmul.f32 1.442695, %v774_v35  ;;  %v878_v48 = vadd.f32 %v2167_v28, %v2165_v45 }
 0x327   : > { %1591 = vpow2.f32 %v805_v37 }
 0x328   : > { %1593 = vpow2.f32 %v807_v14 }
 0x329   : > { %1595 = vpow2.f32 %v809_v44 }
 0x32a   : > { %1597 = vpow2.f32 %v811_v23 }
 0x32b   : > { %885 = vadd.xlane.f32.xlu2 %v884_v22 }
 0x32d   : > { %v2169_v46 = vpop.eup %1591 }
 0x32e   : > { %v2171_v25 = vpop.eup %1593 }
 0x32f   : > { %v869_v49 = vadd.f32 %v2171_v25, %v2169_v46  ;;  %v2177_v55 = vpop.eup %1595 }
 0x330   : > { %v2179_v24 = vpop.eup %1597 }
 0x331   : > { %870 = vadd.xlane.f32.xlu1 %v869_v49  ;;  %v872_v57 = vadd.f32 %v2179_v24, %v2177_v55 }
 0x333   : > { %879 = vadd.xlane.f32.xlu2 %v878_v48 }
 0x33b   : > { %873 = vadd.xlane.f32.xlu2 %v872_v57 }
 0x35c   : > { %v907_v26 = vpop.xlane.xlu1 %906 }
 0x35d   : > { %1599 = vrcp.f32 %v907_v26 }
 0x363   : > { %v1600_v20 = vpop.eup %1599 }
 0x364   : > { %v945_v56 = vmul.f32 %v1600_v20, %v907_v26  ;;  %v901_v60 = vpop.xlane.xlu1 %900 }
 0x365   : > { %1601 = vrcp.f32 %v901_v60 }
 0x366   : > { %v961_v61 = vsub.f32 2.0, %v945_v56 }
 0x368   : > { %v977_v63 = vmul.f32 %v1600_v20, %v961_v61 }
 0x36a   : > { %v2187_v8 = vmul.f32 %v2059_v4, %v977_v63  ;;  %v2190_v53 = vmul.f32 %v2061_v9, %v977_v63 }
 0x36b   : > { %v1602_v52 = vpop.eup %1601 }
 0x36c   : > { %v943_v1 = vmul.f32 %v1602_v52, %v901_v60  ;;  %v895_v7 = vpop.xlane.xlu1 %894  ;;  %1037 = vst [vmem:[%s2192_s24 + $0xc0] sm:$0xff] %v2187_v8 }
 0x36d   : > { %1603 = vrcp.f32 %v895_v7  ;;  %1038 = vst [vmem:[%s2192_s24 + $0xc8] sm:$0xff] %v2190_v53 }
 0x36e   : > { %v959_v2 = vsub.f32 2.0, %v943_v1  ;;  %v913_v4 = vpop.xlane.xlu2 %912 }
 0x36f   : > { %1605 = vrcp.f32 %v913_v4 }
 0x370   : > { %v975_v29 = vmul.f32 %v1602_v52, %v959_v2 }
 0x372   : > { %v2199_v9 = vmul.f32 %v2069_v17, %v975_v29  ;;  %v2202_v40 = vmul.f32 %v2071_v27, %v975_v29 }
 0x373   : > { %v1604_v31 = vpop.eup %1603 }
 0x374   : > { %v941_v6 = vmul.f32 %v1604_v31, %v895_v7  ;;  %1033 = vst [vmem:[%s2192_s24 + $0xa0] sm:$0xff] %v2199_v9 }
 0x375   : > { %v1606_v32 = vpop.eup %1605  ;;  %1034 = vst [vmem:[%s2192_s24 + $0xa8] sm:$0xff] %v2202_v40 }
 0x376   : > { %v947_v11 = vmul.f32 %v1606_v32, %v913_v4  ;;  %v957_v12 = vsub.f32 2.0, %v941_v6  ;;  %v916_v51 = vpop.xlane.xlu2 %915 }
 0x377   : > { %1607 = vrcp.f32 %v916_v51 }
 0x378   : > { %v963_v17 = vsub.f32 2.0, %v947_v11  ;;  %v973_v13 = vmul.f32 %v1604_v31, %v957_v12 }
 0x37a   : > { %v979_v35 = vmul.f32 %v1606_v32, %v963_v17  ;;  %v2209_v27 = vmul.f32 %v2077_v39, %v973_v13  ;;  %v2212_v37 = vmul.f32 %v2079_v50, %v973_v13 }
 0x37c   : > { %v1009_v14 = vmul.f32 %v2081_v54, %v979_v35  ;;  %v1010_v16 = vmul.f32 %v2086_v19, %v979_v35  ;;  %1029 = vst [vmem:[%s2192_s24 + $0x80] sm:$0xff] %v2209_v27 }
 0x37d   : > { %v1608_v38 = vpop.eup %1607  ;;  %1030 = vst [vmem:[%s2192_s24 + $0x88] sm:$0xff] %v2212_v37 }
 0x37e   : > { %v948_v22 = vmul.f32 %v1608_v38, %v916_v51  ;;  %v910_v44 = vpop.xlane.xlu2 %909  ;;  %1041 = vst [vmem:[%s2192_s24 + $0xe0] sm:$0xff] %v1009_v14 }
 0x37f   : > { %1609 = vrcp.f32 %v910_v44  ;;  %1042 = vst [vmem:[%s2192_s24 + $0xe8] sm:$0xff] %v1010_v16 }
 0x380   : > { %v964_v39 = vsub.f32 2.0, %v948_v22 }
 0x382   : > { %v980_v23 = vmul.f32 %v1608_v38, %v964_v39 }
 0x384   : > { %v1011_v50 = vmul.f32 %v2091_v42, %v980_v23  ;;  %v1012_v54 = vmul.f32 %v2094_v0, %v980_v23  ;;  %v889_v49 = vpop.xlane.xlu1 %888 }
 0x385   : > { %v1610_v19 = vpop.eup %1609  ;;  %1611 = vrcp.f32 %v889_v49 }
 0x386   : > { %v946_v48 = vmul.f32 %v1610_v19, %v910_v44  ;;  %1043 = vst [vmem:[%s2192_s24 + $0xf0] sm:$0xff] %v1011_v50  ;;  %1050 = vmatpush.xpose.msrb.mxu1 %v1011_v50  ;;  %1070 = vmatpush.xpose.msra.mxu2 %v1012_v54  ;;  %v904_v57 = vpop.xlane.xlu2 %903 }
 0x387   : > { %1044 = vst [vmem:[%s2192_s24 + $0xf8] sm:$0xff] %v1012_v54  ;;  %1613 = vrcp.f32 %v904_v57 }
 0x388   : > { %v962_v26 = vsub.f32 2.0, %v946_v48 }
 0x38a   : > { %1051 = vmatpush.xpose.msrb.mxu1 %v1009_v14  ;;  %1071 = vmatpush.xpose.msra.mxu2 %v1010_v16  ;;  %v978_v20 = vmul.f32 %v1610_v19, %v962_v26 }
 0x38b   : > { %v1612_v56 = vpop.eup %1611 }
 0x38c   : > { %v939_v42 = vmul.f32 %v1612_v56, %v889_v49  ;;  %v1007_v0 = vmul.f32 %v2101_v5, %v978_v20  ;;  %v1008_v60 = vmul.f32 %v2104_v10, %v978_v20  ;;  %v883_v61 = vpop.xlane.xlu1 %882 }
 0x38d   : > { %v1614_v63 = vpop.eup %1613  ;;  %1615 = vrcp.f32 %v883_v61 }
 0x38e   : > { %v944_v52 = vmul.f32 %v1614_v63, %v904_v57  ;;  %v955_v1 = vsub.f32 2.0, %v939_v42  ;;  %1039 = vst [vmem:[%s2192_s24 + $0xd0] sm:$0xff] %v1007_v0  ;;  %1052 = vmatpush.xpose.msrb.mxu1 %v1007_v0  ;;  %1072 = vmatpush.xpose.msra.mxu2 %v1008_v60  ;;  %v898_v7 = vpop.xlane.xlu2 %897 }
 0x38f   : > { %1040 = vst [vmem:[%s2192_s24 + $0xd8] sm:$0xff] %v1008_v60  ;;  %1617 = vrcp.f32 %v898_v7 }
 0x390   : > { %v960_v2 = vsub.f32 2.0, %v944_v52  ;;  %v971_v4 = vmul.f32 %v1612_v56, %v955_v1 }
 0x392   : > { %1053 = vmatpush.xpose.msrb.mxu1 %v2187_v8  ;;  %1073 = vmatpush.xpose.msra.mxu2 %v2190_v53  ;;  %v976_v5 = vmul.f32 %v1614_v63, %v960_v2  ;;  %v993_v10 = vmul.f32 %v2115_v21, %v971_v4  ;;  %v994_v29 = vmul.f32 %v2118_v33, %v971_v4  ;;  %v1046_v2 = vld.sshfl [vmem:[#allocation1] sm:$0xff pattern:$0x75316420] }
 0x393   : > { %v1616_v31 = vpop.eup %1615  ;;  %v1091_v4 = vld [vmem:[%s2371_s4] sm:$0xf] }
 0x394   : > { %v937_v6 = vmul.f32 %v1616_v31, %v883_v61  ;;  %v1003_v32 = vmul.f32 %v2109_v15, %v976_v5  ;;  %v1004_v11 = vmul.f32 %v2113_v18, %v976_v5  ;;  %v877_v12 = vpop.xlane.xlu1 %876  ;;  %1025 = vst [vmem:[%s2192_s24 + $0x60] sm:$0xff] %v993_v10  ;;  %v1731_v5 = vmov 0  }
 0x395   : > { %v1618_v51 = vpop.eup %1617  ;;  %1619 = vrcp.f32 %v877_v12  ;;  %1026 = vst [vmem:[%s2192_s24 + $0x68] sm:$0xff] %v994_v29  ;;  %1533 = vset.pattern.permute.xlu2 %v1731_v5  ;;  %1534 = vset.pattern.permute.xlu0 %v1731_v5 }
 0x396   : > { %v942_v8 = vmul.f32 %v1618_v51, %v898_v7  ;;  %v953_v17 = vsub.f32 2.0, %v937_v6  ;;  %1035 = vst [vmem:[%s2192_s24 + $0xb0] sm:$0xff] %v1003_v32  ;;  %1054 = vmatpush.xpose.msrb.mxu1 %v1003_v32  ;;  %1074 = vmatpush.xpose.msra.mxu2 %v1004_v11  ;;  %v892_v21 = vpop.xlane.xlu2 %891 }
 0x397   : > { %1036 = vst [vmem:[%s2192_s24 + $0xb8] sm:$0xff] %v1004_v11  ;;  %1621 = vrcp.f32 %v892_v21  ;;  %1094 = vperm.xlu2 %1533, %v1091_v4  }
 0x398   : > { %v958_v33 = vsub.f32 2.0, %v942_v8  ;;  %v969_v15 = vmul.f32 %v1616_v31, %v953_v17 }
 0x39a   : > { %1055 = vmatpush.xpose.msrb.mxu1 %v2199_v9  ;;  %1075 = vmatpush.xpose.msra.mxu2 %v2202_v40  ;;  %v974_v18 = vmul.f32 %v1618_v51, %v958_v33  ;;  %v989_v53 = vmul.f32 %v2131_v59, %v969_v15  ;;  %v990_v13 = vmul.f32 %v2133_v43, %v969_v15 }
 0x39b   : > { %v1620_v35 = vpop.eup %1619 }
 0x39c   : > { %v935_v14 = vmul.f32 %v1620_v35, %v877_v12  ;;  %v999_v16 = vmul.f32 %v2125_v34, %v974_v18  ;;  %v1000_v38 = vmul.f32 %v2129_v58, %v974_v18  ;;  %1021 = vst [vmem:[%s2192_s24 + $0x40] sm:$0xff] %v989_v53 }
 0x39d   : > { %v1622_v22 = vpop.eup %1621  ;;  %1022 = vst [vmem:[%s2192_s24 + $0x48] sm:$0xff] %v990_v13 }
 0x39e   : > { %v951_v44 = vsub.f32 2.0, %v935_v14  ;;  %v940_v39 = vmul.f32 %v1622_v22, %v892_v21  ;;  %1031 = vst [vmem:[%s2192_s24 + $0x90] sm:$0xff] %v999_v16  ;;  %1056 = vmatpush.xpose.msrb.mxu1 %v999_v16  ;;  %1076 = vmatpush.xpose.msra.mxu2 %v1000_v38  ;;  %v886_v9 = vpop.xlane.xlu2 %885 }
 0x39f   : > { %1032 = vst [vmem:[%s2192_s24 + $0x98] sm:$0xff] %v1000_v38  ;;  %1623 = vrcp.f32 %v886_v9 }
 0x3a0   : > { %v956_v59 = vsub.f32 2.0, %v940_v39  ;;  %v967_v43 = vmul.f32 %v1620_v35, %v951_v44 }
 0x3a2   : > { %1057 = vmatpush.xpose.msrb.mxu1 %v2209_v27  ;;  %1077 = vmatpush.xpose.msra.mxu2 %v2212_v37  ;;  %v972_v34 = vmul.f32 %v1622_v22, %v956_v59  ;;  %v985_v58 = vmul.f32 %v2145_v41, %v967_v43  ;;  %v986_v40 = vmul.f32 %v2148_v30, %v967_v43 }
 0x3a4   : > { %v871_v23 = vpop.xlane.xlu1 %870  ;;  %v995_v50 = vmul.f32 %v2141_v62, %v972_v34  ;;  %v996_v54 = vmul.f32 %v2143_v3, %v972_v34  ;;  %1017 = vst [vmem:[%s2192_s24 + $0x20] sm:$0xff] %v985_v58 }
 0x3a5   : > { %v1624_v49 = vpop.eup %1623  ;;  %1625 = vrcp.f32 %v871_v23  ;;  %1018 = vst [vmem:[%s2192_s24 + $0x28] sm:$0xff] %v986_v40 }
 0x3a6   : > { %v938_v19 = vmul.f32 %v1624_v49, %v886_v9  ;;  %1027 = vst [vmem:[%s2192_s24 + $0x70] sm:$0xff] %v995_v50  ;;  %1058 = vmatpush.xpose.msrb.mxu1 %v995_v50  ;;  %1078 = vmatpush.xpose.msra.mxu2 %v996_v54  ;;  %v880_v27 = vpop.xlane.xlu2 %879 }
 0x3a7   : > { %1028 = vst [vmem:[%s2192_s24 + $0x78] sm:$0xff] %v996_v54  ;;  %1627 = vrcp.f32 %v880_v27 }
 0x3a8   : > { %v954_v41 = vsub.f32 2.0, %v938_v19 }
 0x3aa   : > { %1059 = vmatpush.xpose.msrb.mxu1 %v993_v10  ;;  %1079 = vmatpush.xpose.msra.mxu2 %v994_v29  ;;  %v970_v30 = vmul.f32 %v1624_v49, %v954_v41  ;;  %v1090_v29 = vld [vmem:[%s2370_s3] sm:$0xf] }
 0x3ab   : > { %v1626_v62 = vpop.eup %1625 }
 0x3ac   : > { %v933_v37 = vmul.f32 %v1626_v62, %v871_v23  ;;  %v991_v3 = vmul.f32 %v2157_v47, %v970_v30  ;;  %v992_v48 = vmul.f32 %v2159_v36, %v970_v30 }
 0x3ad   : > { %v1628_v57 = vpop.eup %1627 }
 0x3ae   : > { %v949_v26 = vsub.f32 2.0, %v933_v37  ;;  %v936_v20 = vmul.f32 %v1628_v57, %v880_v27  ;;  %1023 = vst [vmem:[%s2192_s24 + $0x50] sm:$0xff] %v991_v3  ;;  %1060 = vmatpush.xpose.msrb.mxu1 %v991_v3  ;;  %1080 = vmatpush.xpose.msra.mxu2 %v992_v48  ;;  %v874_v56 = vpop.xlane.xlu2 %873 }
 0x3af   : > { %1024 = vst [vmem:[%s2192_s24 + $0x58] sm:$0xff] %v992_v48  ;;  %1629 = vrcp.f32 %v874_v56 }
 0x3b0   : > { %v965_v42 = vmul.f32 %v1626_v62, %v949_v26  ;;  %v952_v0 = vsub.f32 2.0, %v936_v20 }
 0x3b2   : > { %1061 = vmatpush.xpose.msrb.mxu1 %v989_v53  ;;  %1081 = vmatpush.xpose.msra.mxu2 %v990_v13  ;;  %v968_v47 = vmul.f32 %v1628_v57, %v952_v0  ;;  %v981_v36 = vmul.f32 %v2169_v46, %v965_v42  ;;  %v982_v60 = vmul.f32 %v2171_v25, %v965_v42 }
 0x3b4   : > { %v987_v61 = vmul.f32 %v2165_v45, %v968_v47  ;;  %v988_v63 = vmul.f32 %v2167_v28, %v968_v47  ;;  %1013 = vst [vmem:[%s2192_s24] sm:$0xff] %v981_v36  ;;  %v1047_v28 = vld.sshfl [vmem:[#allocation1 + $0x8] sm:$0xff pattern:$0x75316420] }
 0x3b5   : > { %v1630_v52 = vpop.eup %1629  ;;  %1014 = vst [vmem:[%s2192_s24 + $0x8] sm:$0xff] %v982_v60 }
 0x3b6   : > { %v934_v1 = vmul.f32 %v1630_v52, %v874_v56  ;;  %1019 = vst [vmem:[%s2192_s24 + $0x30] sm:$0xff] %v987_v61  ;;  %1062 = vmatpush.xpose.msrb.mxu1 %v987_v61  ;;  %1082 = vmatpush.xpose.msra.mxu2 %v988_v63 }
 0x3b7   : > { %1020 = vst [vmem:[%s2192_s24 + $0x38] sm:$0xff] %v988_v63 }
 0x3b8   : > { %v950_v7 = vsub.f32 2.0, %v934_v1 }
 0x3ba   : > { %1063 = vmatpush.xpose.msrb.mxu1 %v985_v58  ;;  %1083 = vmatpush.xpose.msra.mxu2 %v986_v40  ;;  %v966_v46 = vmul.f32 %v1630_v52, %v950_v7 }
 0x3bc   : > { %v983_v25 = vmul.f32 %v2177_v55, %v966_v46  ;;  %v984_v45 = vmul.f32 %v2179_v24, %v966_v46 }
 0x3be   : > { %1015 = vst [vmem:[%s2192_s24 + $0x10] sm:$0xff] %v983_v25  ;;  %1064 = vmatpush.xpose.msrb.mxu1 %v983_v25  ;;  %1084 = vmatpush.xpose.msra.mxu2 %v984_v45 }
 0x3bf   : > { %1016 = vst [vmem:[%s2192_s24 + $0x18] sm:$0xff] %v984_v45 }
 0x3c2   : > { %1065 = vmatpush.xpose.msrb.mxu1 %v981_v36  ;;  %1085 = vmatpush.xpose.msra.mxu2 %v982_v60 }
 0x3c5   : > { %1086 = vmatmul.f32.vlgmr.msra.gmra.mxu2 %v1047_v28  ;;  %1066 = vmatmul.f32.vlgmr.msrb.gmra.mxu1 %v1046_v2 }
 0x3f1   : > { %v1095_v31 = vpop.permute.xlu2 %1094 }
 0x442   : > { %v1067_v55 = vpop.f32.mrf.mxu1 }
 0x448   : > { %v1087_v24 = vpop.f32.mrf.mxu2 }
 0x449   : > { %v1088_v10 = vadd.f32 %v1087_v24, %v1067_v55 }
 0x44b   : > { %1436 = vmatpush.msk.msra.mxu1 %vm375_vm0, %v1088_v10 }
 0x44c   : > { %1437 = vmatmul.msk.f32.vlgmr.msra.gmra.mxu1 %vm362_vm1, %v1090_v29 }
 0x4c6   : > { %1127 = sbr.rel (%p1439_p0) target bundleno = 1229 (0x4cd), region = 52 }
 0x4c9   : > { %v1120_v6 = vpop.f32.mrf.mxu1 }
 0x4ca   : > { %v1121_v32 = vadd.f32 %v1120_v6, %v1095_v31 }
 0x4cc   : > { %1132 = vst [vmem:[%s1131_s21] sm:$0xf] %v1121_v32 }
 0x4cd PF: > { %p1133_p1 = scmp.eq.s32.totalorder %s1717_s9, 1  ;;  %p1441_p2 = scmp.ne.s32.totalorder %s1717_s9, 1 }
 0x4ce   : > { %s1137_s22 = sshra.s32 (!%p1441_p2), %s1438_s26, 7 }
 0x4cf   : > { %1136 = sbr.rel (%p1441_p2) target bundleno = 1237 (0x4d5), region = 56  ;;  %s1442_s16 = sshll.u32 (!%p1441_p2), %s1137_s22, 2 }
 0x4d0   : > { %s1328_s11 = scalar_lea.vmem (!%p1441_p2), %s2374_s7, %s1442_s16 }
 0x4d4   : > { %1443 = vst [vmem:[%s1328_s11 + $0x8] sm:$0xf] %v1121_v32 }
 0x4d5 PF: > { %p1143_p4 = scmp.eq.s32.totalorder %s1713_s30, 1 }
 0x4d7   : > { %p1144_p5 = pnand %p1143_p4, %p1133_p1 }
 0x4d9   : > { %1147 = sbr.rel (%p1144_p5) target bundleno = 1661 (0x67d), region = 60 }
 0x4de   : > { %v1148_v11 = vld [vmem:[%s2374_s7] sm:$0xff]  ;;  %v1444_v12 = vld [vmem:[%s2374_s7 + $0x8] sm:$0xff]  ;;  %v1732_v16 = vmov 839922192   ;;  %v1733_v3 = vmov 0  }
 0x4df   : > { %1150 = vst [vmem:[#allocation1] ss:$2 sm:$0xff] %v1148_v11  ;;  %v1177_v38 = vunpack.c.l.s4 %v1732_v16  ;;  %1631 = vset.pattern.permute.xlu2 %v1733_v3  ;;  %1632 = vset.pattern.permute.xlu0 %v1733_v3  ;;  %v1209_v61 = vld [vmem:[%s2372_s5] sm:$0xf] }
 0x4e0   : > { %v1222_v7 = vld [vmem:[%s2373_s6] sm:$0xf] }
 0x4e1   : > { %v1178_v44 = vunpack.c.0.s8 %v1177_v38 }
 0x4e6   : > { %v1151_v51 = vld.sshfl [vmem:[#allocation1] sm:$0xff pattern:$0x75316420]  ;;  %v1152_v8 = vld.sshfl [vmem:[#allocation1 + $0x8] sm:$0xff pattern:$0x75316420] }
 0x4e7   : > { %v1155_v17 = vsel %vm375_vm0, %v1151_v51, 0.0  ;;  %v1156_v21 = vsel %vm375_vm0, %v1152_v8, 0.0  ;;  %1163 = vst [vmem:[#allocation1] ss:$2 sm:$0xff] %v1444_v12 }
 0x4e8   : > { %v1157_v33 = vadd.f32 %v1156_v21, %v1155_v17 }
 0x4ea   : > { %1158 = vadd.xlane.f32.xlu0 %v1157_v33 }
 0x4ee   : > { %v1164_v15 = vld.sshfl [vmem:[#allocation1] sm:$0xff pattern:$0x75316420]  ;;  %v1165_v18 = vld.sshfl [vmem:[#allocation1 + $0x8] sm:$0xff pattern:$0x75316420] }
 0x4ef   : > { %v1168_v53 = vsel %vm375_vm0, %v1164_v15, 0.0  ;;  %v1169_v13 = vsel %vm375_vm0, %v1165_v18, 0.0 }
 0x4f0   : > { %v1170_v35 = vadd.f32 %v1169_v13, %v1168_v53 }
 0x4f2   : > { %1171 = vadd.xlane.f32.xlu0 %v1170_v35 }
 0x55d   : > { %v1159_v14 = vpop.xlane.xlu0 %1158 }
 0x565   : > { %v1172_v22 = vpop.xlane.xlu0 %1171 }
 0x566   : > { %v1173_v39 = vadd.f32 %v1172_v22, %v1159_v14 }
 0x568   : > { %v1174_v9 = vmul.f32 0.001953125, %v1173_v39 }
 0x56a   : > { %v1179_v59 = vperm.slane %v1174_v9, %v1178_v44 }
 0x56c   : > { %v1181_v43 = vsub.f32 %v1148_v11, %v1179_v59  ;;  %v1194_v58 = vsub.f32 %v1444_v12, %v1179_v59 }
 0x56e   : > { %v1182_v34 = vmul.f32 %v1181_v43, %v1181_v43  ;;  %v1195_v40 = vmul.f32 %v1194_v58, %v1194_v58 }
 0x570   : > { %1184 = vst [vmem:[#allocation1] ss:$2 sm:$0xff] %v1182_v34 }
 0x577   : > { %v1185_v23 = vld.sshfl [vmem:[#allocation1] sm:$0xff pattern:$0x75316420]  ;;  %v1186_v50 = vld.sshfl [vmem:[#allocation1 + $0x8] sm:$0xff pattern:$0x75316420] }
 0x578   : > { %v1189_v54 = vsel %vm375_vm0, %v1185_v23, 0.0  ;;  %v1190_v49 = vsel %vm375_vm0, %v1186_v50, 0.0  ;;  %1197 = vst [vmem:[#allocation1] ss:$2 sm:$0xff] %v1195_v40 }
 0x579   : > { %v1191_v19 = vadd.f32 %v1190_v49, %v1189_v54 }
 0x57b   : > { %1192 = vadd.xlane.f32.xlu1 %v1191_v19 }
 0x57f   : > { %v1198_v27 = vld.sshfl [vmem:[#allocation1] sm:$0xff pattern:$0x75316420]  ;;  %v1199_v41 = vld.sshfl [vmem:[#allocation1 + $0x8] sm:$0xff pattern:$0x75316420] }
 0x580   : > { %v1202_v30 = vsel %vm375_vm0, %v1198_v27, 0.0  ;;  %v1203_v62 = vsel %vm375_vm0, %v1199_v41, 0.0 }
 0x581   : > { %v1204_v37 = vadd.f32 %v1203_v62, %v1202_v30 }
 0x583   : > { %1205 = vadd.xlane.f32.xlu1 %v1204_v37 }
 0x5ee   : > { %v1193_v48 = vpop.xlane.xlu1 %1192 }
 0x5f6   : > { %v1206_v57 = vpop.xlane.xlu1 %1205 }
 0x5f7   : > { %v1207_v26 = vadd.f32 %v1206_v57, %v1193_v48 }
 0x5f9   : > { %v1208_v20 = vmul.f32 0.001953125, %v1207_v26 }
 0x5fb   : > { %v1210_v56 = vadd.f32 1e-05, %v1208_v20 }
 0x5fd   : > { %1633 = vrsqrt.f32 %v1210_v56  ;;  %vm1217_vm4 = vweird.f32 %v1210_v56 }
 0x603   : > { %v1634_v42 = vpop.eup %1633 }
 0x604   : > { %v1212_v0 = vmul.f32 %v1634_v42, %v1210_v56  ;;  %vm1218_vm3 = vweird.f32 %v1634_v42 }
 0x605   : > { %vm1219_vm5 = vmor %vm1217_vm4, %vm1218_vm3 }
 0x606   : > { %v1213_v47 = vmul.f32 %v1634_v42, %v1212_v0 }
 0x608   : > { %v1214_v36 = vmul.f32 0.5, %v1213_v47 }
 0x60a   : > { %v1215_v60 = vsub.f32 1.5, %v1214_v36 }
 0x60c   : > { %v1216_v63 = vmul.f32 %v1634_v42, %v1215_v60 }
 0x60e   : > { %v1220_v52 = vsel %vm1219_vm5, %v1634_v42, %v1216_v63 }
 0x60f   : > { %v1221_v1 = vmul.f32 %v1220_v52, %v1209_v61 }
 0x611   : > { %1225 = vperm.xlu2 %1631, %v1221_v1  }
 0x619   : > { %1235 = vperm.xlu2 %1631, %v1222_v7  }
 0x66b   : > { %v1226_v46 = vpop.permute.xlu2 %1225 }
 0x66c   : > { %v1230_v25 = vperm.slane %v1226_v46, %v1178_v44 }
 0x66e   : > { %v1232_v28 = vmul.f32 %v1230_v25, %v1181_v43  ;;  %v1249_v2 = vmul.f32 %v1230_v25, %v1194_v58 }
 0x673   : > { %v1236_v45 = vpop.permute.xlu2 %1235 }
 0x674   : > { %v1240_v4 = vperm.slane %v1236_v45, %v1178_v44 }
 0x676   : > { %v1242_v5 = vadd.f32 %v1240_v4, %v1232_v28  ;;  %v1250_v55 = vadd.f32 %v1249_v2, %v1240_v4 }
 0x678   : > { %vm1243_vm6 = vcmp.ge.f32.partialorder %v1242_v5, 0.0  ;;  %v1244_v24 = vmul.f32 0.01, %v1242_v5  ;;  %vm1251_vm7 = vcmp.ge.f32.partialorder %v1250_v55, 0.0  ;;  %v1252_v10 = vmul.f32 0.01, %v1250_v55 }
 0x67a   : > { %v1245_v29 = vsel %vm1243_vm6, %v1242_v5, %v1244_v24  ;;  %v1253_v31 = vsel %vm1251_vm7, %v1250_v55, %v1252_v10 }
 0x67b   : > { %1246 = vst [vmem:[%s2374_s7] sm:$0xff] %v1245_v29 }
 0x67c   : > { %1446 = vst [vmem:[%s2374_s7 + $0x8] sm:$0xff] %v1253_v31 }
 0x67d PF: > { %s1455_s23 = sshll.u32 %s1713_s30, 5  ;;  %s1450_s13 = sshll.u32 %s1717_s9, 6 }
 0x67e   : > { %s1274_s14 = sshll.u32 %s2192_s24, 4  ;;  %s1271_s17 = sadd.s32 %s1455_s23, %s1450_s13  ;;  %s1275_s14 = int_to_ptr.vmem [resolvable:$true] %s1274_s14 }
 0x67f   : > { %s1451_s26 = sshll.u32 %s1271_s17, 3  ;;  %s1256_s25 = scalar_lea.sflag [#allocation3], %s331_s15 }
 0x680   : > { %s1273_s22 = scalar_lea.hbm %s2375_s8, %s1451_s26  ;;  %s1655_s24 = scalar_lea.hbm %s2375_s8, 1024 }
 0x681   : > { %s1276_s16 = sshll.u32 %s1273_s22, 4  ;;  %s1277_s16 = int_to_ptr.hbm [resolvable:$true] %s1276_s16 }
 0x682   : > { %s1649_s10 = sshra.s32 %s1277_s16, 4  ;;  %s1650_s10 = int_to_ptr.hbm [resolvable:$true] %s1649_s10 }
 0x683   : > { %s1651_s11 = scalar_lea.hbm %s1650_s10, 256  ;;  %p1656_p10 = scmp.lt.s32.totalorder %s1650_s10, %s2375_s8 }
 0x684   : > { %p1652_p6 = scmp.ne.s32.totalorder %s1650_s10, %s1651_s11  ;;  %p1657_p11 = scmp.lt.s32.totalorder %s1655_s24, %s1651_s11 }
 0x686   : > { %p1653_p7 = pnand %p1652_p6, %p1832_p3  ;;  %p1658_p12 = por %p1657_p11, %p1656_p10 }
 0x688   : > { %p1654_p9 = pneg %p1653_p7 }
 0x68a   : > { %p1659_p13 = pnand %p1658_p12, %p1654_p9 }
 0x68c   : > { %1662 = shalt.err (!%p1659_p13)
}
 0x68d   : > { %s1734_s15 = smov 256   ;;  %s1735_s17 = smov 16  }
 0x68e   : > { %1456 = dma.vmem_to_hbm [thread:$0]  (%p1832_p3), %s1275_s14, 4096, %s1277_s16, %s1256_s25, %s1734_s15, %s1734_s15, %s1735_s17  }
 0x68f PF: > { %p1462_p0 = scmp.ge.s32.totalorder %s1729_s12, 2  ;;  %s1294_s26 = sand.u32 1, %s1701_s27  }
 0x690   : > { %s1295_s20 = scalar_lea.sflag [#allocation3], %s1294_s26 }
 0x691   : > { %p1459_p1 = pnand %p1462_p0, %p1841_p8 }
 0x693   : > { %p1460_p2 = pneg %p1459_p1 }
 0x695   : > { %1696 = dma.done.wait (%p1460_p2), %s1295_s20, 4096  }
 0x696   : > { %1698 = vsyncadd (%p1460_p2), %s1295_s20, 4294963200  ;;  %s22_s12 = sadd.s32 1, %s1729_s12   ;;  %s2387_s21 = sld [smem:[#allocation9_spill]] }
 0x697   : > { %p19_p4 = scmp.ge.s32.totalorder %s22_s12, 6   ;;  %s2388_s30 = sld [smem:[#allocation5_spill]] }
 0x698   : > { %s2389_s9 = sld [smem:[#allocation6_spill]]  ;;  %s2392_s27 = smov %s1705_s28 }
 0x699   : > { %s2390_s10 = sld [smem:[#allocation7_spill]]  ;;  %s2393_s28 = smov %s1709_s29 }
 0x69a   : > { %s2391_s11 = sld [smem:[#allocation8_spill]]  ;;  %21 = sbr.rel (!%p19_p4) target bundleno = 5 (0x5), region = 109 }
 0x69c   : > { %s2394_s29 = smov %s2387_s21 }
 0x69f   :  { %1301 = vsyncpa [#allocation3], 1 }
 0x6a0   :  { %1303 = vsyncpa [#allocation3 + $0x1], 1 }

</bundles_post_ra>
